<compile_context>
chip_gen: v6e
topology: v6e:2x2x1
jax: 0.10.0
libtpu: 0.0.40
codegen_flags: <defaults>
</compile_context>

<pallas_src>
import math
import numpy as np
import jax
import jax.numpy as jnp
from jax.experimental import pallas as pl
from jax.experimental.pallas import tpu as pltpu

NBINS = 9
POOL = 8
GAUSSIAN_WINDOW = 16

_OPERAND_DTYPE = jnp.bfloat16   # MXU-native operand dtype (f32 accumulation)


# ----------------------------- parameter setup (plain numpy glue) -----------

def _gaussian_1d(kernlen: int, std: int) -> np.ndarray:
    n = np.arange(kernlen, dtype=np.float32)
    n = n - n.mean()
    n = n / std
    return np.exp(-0.5 * n ** 2).astype(np.float32)


def _bilinear_matrix(out_size: int, in_size: int) -> np.ndarray:
    # PyTorch F.interpolate(mode='bilinear', align_corners=False) as a matrix.
    L = np.zeros((out_size, in_size), np.float32)
    scale = in_size / out_size
    for i in range(out_size):
        src = max((i + 0.5) * scale - 0.5, 0.0)
        i0 = min(int(math.floor(src)), in_size - 1)
        i1 = min(i0 + 1, in_size - 1)
        lam = src - i0
        L[i, i0] += 1.0 - lam
        L[i, i1] += lam
    return L


def _pool_matrix(size: int, pool: int) -> np.ndarray:
    nc = size // pool
    P = np.zeros((nc, size), np.float32)
    for c in range(nc):
        P[c, c * pool:(c + 1) * pool] = 1.0
    return P


def _choose_batch_pack(B: int, W: int) -> int:
    # Pack images along lanes only when the output lane dim would otherwise be
    # narrow (< 128).  Keep nchunks >= 2 when possible so the grid can be
    # sharded across the two v7x TensorCores, and cap the unrolled per-image
    # loop at 4.
    if W >= 128:
        return 1
    cap = max(1, 128 // W)
    if B >= 2:
        cap = min(cap, max(1, B // 2))
    cap = min(cap, 4)
    for cand in range(min(B, cap), 0, -1):
        if B % cand == 0:
            return cand
    return 1


def _vmem_limit_bytes(H, W, Hc, Wc, nb, nbins, in_itemsize, out_itemsize):
    def buf(rows, cols, itemsize):
        return (-(-rows // 16) * 16) * (-(-cols // 128) * 128) * itemsize

    est = 0
    est += 2 * nb * buf(H, W, in_itemsize)               # input blocks (x2 bufs)
    est += 2 * buf(nbins * H, nb * W, out_itemsize)      # output blocks
    est += 2 * (buf(nb * W, nb * Wc, 2) + buf(Hc, H, 2)
                + buf(H, Hc, 2) + buf(nb * Wc, nb * W, 2))   # constants
    est += buf(H + 2, W + 2, 4)                          # xpad scratch
    est += buf(nbins * H, nb * W, 2)                     # c_ref
    est += buf(H, nbins * nb * Wc, 2)                    # cp2_ref
    est += buf(nbins * H, nb * Wc, 2)                    # u_ref
    est += (buf(nbins * H, nb * Wc, 4)                   # cp f32 temp
            + buf(H, nbins * nb * Wc, 4)                 # up f32 temp
            + buf(nbins * H, nb * W, 4))                 # final matmul temp
    return int(min(max(2 * est, 32 << 20), 64 << 20))


# ----------------------------------------------------------- Pallas kernel --

def _make_hog_kernel(H: int, W: int, Hc: int, Wc: int, nbins: int, nb: int):
    # sin(k*pi/nbins) > 0 for k=1..nbins-1, so the half-plane test
    # gxa*cos - gys*sin >= 0 is equivalent to gys <= gxa*cot_k.
    cotb = [math.cos(k * math.pi / nbins) / math.sin(k * math.pi / nbins)
            for k in range(1, nbins)]
    nbWc = nb * Wc

    def kernel(xs_ref, pwt_ref, prow_ref, lrow_ref, rt_ref, out_ref,
               xpad_ref, c_ref, cp2_ref, u_ref):
        for b in range(nb):
            # --- reflect-padded image built in VMEM (no HBM pad pass) -------
            xb = xs_ref[b].astype(jnp.float32)                       # (H, W)
            xpad_ref[1:H + 1, 1:W + 1] = xb
            xpad_ref[0:1, 1:W + 1] = xb[1:2, :]
            xpad_ref[H + 1:H + 2, 1:W + 1] = xb[H - 2:H - 1, :]
            xpad_ref[:, 0:1] = xpad_ref[:, 2:3]
            xpad_ref[:, W + 1:W + 2] = xpad_ref[:, W - 1:W]

            # --- separable 3x3 Sobel (cross-correlation, as F.conv2d) -------
            r0 = xpad_ref[0:H, :]
            r1 = xpad_ref[1:H + 1, :]
            r2 = xpad_ref[2:H + 2, :]
            v = (r0 + r2) + 2.0 * r1              # vertical smooth (H, W+2)
            d = r0 - r2                           # vertical diff   (H, W+2)
            gx = v[:, 0:W] - v[:, 2:W + 2]
            gy = (d[:, 0:W] + d[:, 2:W + 2]) + 2.0 * d[:, 1:W + 1]
            mag = jnp.sqrt(gx * gx + gy * gy)     # gaussian folded into pools

            # --- bin = floor(atan2(gx, gy)/pi * nbins) mod nbins ------------
            gxa = jnp.abs(gx)
            gys = jnp.where(gx > 0.0, gy, -gy)
            binf = jnp.zeros((H, W), jnp.float32)
            for cot in cotb:
                binf = binf + (gys <= gxa * cot).astype(jnp.float32)
            binf = jnp.where(gx == 0.0, 0.0, binf)   # atan2(0, .) -> bin 0

            # --- scatter into 9 bin planes stacked along sublanes (bf16) ----
            magh = mag.astype(_OPERAND_DTYPE)
            zero = jnp.zeros_like(magh)
            for k in range(nbins):
                c_ref[k * H:(k + 1) * H, b * W:(b + 1) * W] = jnp.where(
                    binf == float(k), magh, zero)

        # --- column pool (gaussian-weighted): ONE matmul for all bins/imgs --
        cp = jnp.dot(c_ref[...], pwt_ref[...],
                     preferred_element_type=jnp.float32)   # (9H, nb*Wc) f32

        # --- relayout (9H, nbWc) -> (H, 9*nbWc): row stage = 2 wide matmuls -
        for k in range(nbins):
            cp2_ref[:, k * nbWc:(k + 1) * nbWc] = (
                cp[k * H:(k + 1) * H, :].astype(_OPERAND_DTYPE))

        cells = jnp.dot(prow_ref[...], cp2_ref[...],
                        preferred_element_type=jnp.float32)   # (Hc, 9*nbWc)
        up = jnp.dot(lrow_ref[...], cells.astype(_OPERAND_DTYPE),
                     preferred_element_type=jnp.float32)      # (H, 9*nbWc)

        # --- un-relayout into (9H, nbWc) so the output keeps bins on sublanes
        for k in range(nbins):
            u_ref[k * H:(k + 1) * H, :] = (
                up[:, k * nbWc:(k + 1) * nbWc].astype(_OPERAND_DTYPE))

        # --- column upsample for all bins & packed images: one wide matmul,
        #     one lane-dense store of the full (9H, nb*W) output tile --------
        out_ref[...] = jnp.dot(
            u_ref[...], rt_ref[...],
            preferred_element_type=jnp.float32).astype(out_ref.dtype)

    return kernel


def hog_layer_c(x, nbins=NBINS, pool=POOL, gaussian_window=GAUSSIAN_WINDOW,
                out_dtype=jnp.bfloat16):
    B, C, H, W = x.shape
    assert C == 1, "kernel implements in_channels=1 (module default)"
    assert H % pool == 0 and W % pool == 0
    Hc, Wc = H // pool, W // pool

    nb = _choose_batch_pack(B, W)
    nchunks = B // nb

    xs = x[:, 0]   # (B, H, W); f32 cast + reflect pad happen inside the kernel

    # Separable Gaussian window folded into the pool matrices (exact):
    # tile(g g^T)/sum = outer(wr, wc) with wr, wc normalized 1-D windows.
    if gaussian_window:
        assert H % gaussian_window == 0 and W % gaussian_window == 0
        g1 = _gaussian_1d(gaussian_window, gaussian_window // 2)
        s = float(g1.sum())
        wr = np.tile(g1, H // gaussian_window) / s
        wc = np.tile(g1, W // gaussian_window) / s
    else:
        wr = np.ones(H, np.float32)
        wc = np.ones(W, np.float32)

    pwtg = _pool_matrix(W, pool).T * wc[:, None]      # (W, Wc)  column pool
    prowg = _pool_matrix(H, pool) * wr[None, :]       # (Hc, H)  row pool
    lrow = _bilinear_matrix(H, Hc)                    # (H, Hc)  row upsample
    rcol = _bilinear_matrix(W, Wc).T                  # (Wc, W)  col upsample

    pwt_bd = np.zeros((nb * W, nb * Wc), np.float32)  # block-diag (packed imgs)
    rt_bd = np.zeros((nb * Wc, nb * W), np.float32)
    for b in range(nb):
        pwt_bd[b * W:(b + 1) * W, b * Wc:(b + 1) * Wc] = pwtg
        rt_bd[b * Wc:(b + 1) * Wc, b * W:(b + 1) * W] = rcol

    kernel = _make_hog_kernel(H, W, Hc, Wc, nbins, nb)
    vmem_limit = _vmem_limit_bytes(H, W, Hc, Wc, nb, nbins,
                                   xs.dtype.itemsize,
                                   jnp.dtype(out_dtype).itemsize)

    out2d = pl.pallas_call(
        kernel,
        out_shape=jax.ShapeDtypeStruct((nchunks * nbins * H, nb * W),
                                       out_dtype),
        grid_spec=pltpu.PrefetchScalarGridSpec(
            num_scalar_prefetch=0,
            grid=(nchunks,),
            in_specs=[
                pl.BlockSpec((nb, H, W), lambda c: (c, 0, 0)),
                pl.BlockSpec((nb * W, nb * Wc), lambda c: (0, 0)),
                pl.BlockSpec((Hc, H), lambda c: (0, 0)),
                pl.BlockSpec((H, Hc), lambda c: (0, 0)),
                pl.BlockSpec((nb * Wc, nb * W), lambda c: (0, 0)),
            ],
            out_specs=pl.BlockSpec((nbins * H, nb * W), lambda c: (c, 0)),
            scratch_shapes=[
                pltpu.VMEM((H + 2, W + 2), jnp.float32),            # halo img
                pltpu.VMEM((nbins * H, nb * W), _OPERAND_DTYPE),    # bin planes
                pltpu.VMEM((H, nbins * nb * Wc), _OPERAND_DTYPE),   # relayout
                pltpu.VMEM((nbins * H, nb * Wc), _OPERAND_DTYPE),   # row-done
            ],
        ),
        compiler_params=pltpu.CompilerParams(
            dimension_semantics=("parallel",),
            vmem_limit_bytes=vmem_limit),
    )(xs,
      jnp.asarray(pwt_bd, _OPERAND_DTYPE),
      jnp.asarray(prowg, _OPERAND_DTYPE),
      jnp.asarray(lrow, _OPERAND_DTYPE),
      jnp.asarray(rt_bd, _OPERAND_DTYPE))

    # (nchunks*nbins*H, nb*W) -> (B, nbins, H, W).  For nb == 1 the transpose
    # moves a size-1 axis and is free; nb > 1 only happens for W < 128 where
    # the lane-density win dominates the (small) permute.
    out = out2d.reshape(nchunks, nbins, H, nb, W)
    out = jnp.transpose(out, (0, 3, 1, 2, 4)).reshape(B, nbins, H, W)
    return out


# --------------------------------------------- pure-JAX reference (checking) -

def _hog_ref(x, nbins=NBINS, pool=POOL, gaussian_window=GAUSSIAN_WINDOW):
    B, C, H, W = x.shape
    xp = jnp.pad(x.astype(jnp.float32),
                 ((0, 0), (0, 0), (1, 1), (1, 1)), mode="reflect")
    wx = jnp.array([[1., 0., -1.], [2., 0., -2.], [1., 0., -1.]], jnp.float32)
    wy = wx.T
    wgt = jnp.stack([wx, wy])[:, None]                            # (2,1,3,3)
    g = jax.lax.conv_general_dilated(
        xp, wgt, (1, 1), "VALID", dimension_numbers=("NCHW", "OIHW", "NCHW"))
    gx, gy = g[:, 0], g[:, 1]                                     # (B, H, W)
    mag = jnp.sqrt(gx * gx + gy * gy)
    phase = jnp.arctan2(gx, gy) / math.pi * nbins
    bins = jnp.mod(jnp.floor(phase).astype(jnp.int32), nbins)
    if gaussian_window:
        g1 = _gaussian_1d(gaussian_window, gaussian_window // 2)
        g2 = g1[:, None] * g1[None, :]
        g2 = g2 / g2.sum()
        rr = H // gaussian_window
        if rr > 1:
            g2 = np.tile(g2, (rr, rr))
        mag = mag * jnp.asarray(g2)
    onehot = (bins[:, None] == jnp.arange(nbins)[None, :, None, None])
    hist = onehot.astype(jnp.float32) * mag[:, None]              # (B,9,H,W)
    Hc, Wc = H // pool, W // pool
    pooled = hist.reshape(B, nbins, Hc, pool, Wc, pool).sum(axis=(3, 5))

    def idx_lam(out_size, in_size):
        i = np.arange(out_size)
        src = np.maximum((i + 0.5) * (in_size / out_size) - 0.5, 0.0)
        i0 = np.minimum(np.floor(src).astype(np.int64), in_size - 1)
        i1 = np.minimum(i0 + 1, in_size - 1)
        lam = (src - i0).astype(np.float32)
        return i0, i1, lam

    h0, h1, lh = idx_lam(H, Hc)
    w0, w1, lw = idx_lam(W, Wc)
    p00 = pooled[:, :, h0][:, :, :, w0]
    p01 = pooled[:, :, h0][:, :, :, w1]
    p10 = pooled[:, :, h1][:, :, :, w0]
    p11 = pooled[:, :, h1][:, :, :, w1]
    lh = jnp.asarray(lh)[None, None, :, None]
    lw = jnp.asarray(lw)[None, None, None, :]
    return ((1 - lh) * (1 - lw) * p00 + (1 - lh) * lw * p01
            + lh * (1 - lw) * p10 + lh * lw * p11)


if __name__ == "__main__":
    # bf16 matmul operands + bf16 output -> compare with ~3% relative tolerance.
    key = jax.random.PRNGKey(0)
    x = jax.random.normal(key, (2, 1, 16, 16), dtype=jnp.float32)
    out = jax.block_until_ready(hog_layer_c(x))
    assert out.shape == (2, NBINS, 16, 16)
    ref = _hog_ref(x)
    np.testing.assert_allclose(np.asarray(jnp.asarray(out, jnp.float32)),
                               np.asarray(ref), rtol=3e-2, atol=2e-3)

    # Exercise the lane-packed (nb=2) path and the f32-output path.
    x2 = jax.random.normal(jax.random.PRNGKey(1), (4, 1, 16, 16), jnp.float32)
    out2 = jax.block_until_ready(hog_layer_c(x2, out_dtype=jnp.float32))
    assert out2.shape == (4, NBINS, 16, 16)
    ref2 = _hog_ref(x2)
    np.testing.assert_allclose(np.asarray(out2), np.asarray(ref2),
                               rtol=3e-2, atol=2e-3)

    print("KERNEL_OK")
</pallas_src>

<mosaic_0001>
module attributes {stable_mosaic.version = 11 : i64} {
  func.func @kernel(%arg0: i32, %arg1: memref<1x16x16xf32, #tpu.memory_space<vmem>>, %arg2: memref<16x2xbf16, #tpu.memory_space<vmem>>, %arg3: memref<2x16xbf16, #tpu.memory_space<vmem>>, %arg4: memref<16x2xbf16, #tpu.memory_space<vmem>>, %arg5: memref<2x16xbf16, #tpu.memory_space<vmem>>, %arg6: memref<144x16xbf16, #tpu.memory_space<vmem>>, %arg7: memref<18x18xf32, #tpu.memory_space<vmem>>, %arg8: memref<144x16xbf16, #tpu.memory_space<vmem>>, %arg9: memref<16x18xbf16, #tpu.memory_space<vmem>>, %arg10: memref<144x2xbf16, #tpu.memory_space<vmem>>) attributes {dimension_semantics = [#tpu.dimension_semantics<parallel>], iteration_bounds = array<i64: 2>, scalar_prefetch = 0 : i64, scratch_operands = 4 : i64, tpu.core_type = #tpu.core_type<tc>, window_params = [{transform_indices = @transform_0, window_bounds = array<i64: 1, 16, 16>}, {pipeline_mode = #tpu.pipeline_mode<synchronous>, transform_indices = @transform_1, window_bounds = array<i64: 16, 2>}, {pipeline_mode = #tpu.pipeline_mode<synchronous>, transform_indices = @transform_2, window_bounds = array<i64: 2, 16>}, {pipeline_mode = #tpu.pipeline_mode<synchronous>, transform_indices = @transform_3, window_bounds = array<i64: 16, 2>}, {pipeline_mode = #tpu.pipeline_mode<synchronous>, transform_indices = @transform_4, window_bounds = array<i64: 2, 16>}, {transform_indices = @transform_5, window_bounds = array<i64: 144, 16>}]} {
    %c0 = arith.constant 0 : index
    %c0_0 = arith.constant 0 : index
    %c0_1 = arith.constant 0 : index
    %0 = vector.load %arg1[%c0, %c0_0, %c0_1] : memref<1x16x16xf32, #tpu.memory_space<vmem>>, vector<1x16x16xf32>
    %1 = vector.shape_cast %0 : vector<1x16x16xf32> to vector<16x16xf32>
    %c1 = arith.constant 1 : index
    %c1_2 = arith.constant 1 : index
    %2 = vector.load %arg7[%c1, %c1_2] : memref<18x18xf32, #tpu.memory_space<vmem>>, vector<16x16xf32>
    tpu.vector_store %arg7[%c1, %c1_2], %1 {strides = array<i32>} : memref<18x18xf32, #tpu.memory_space<vmem>>, vector<16x16xf32>,
    %3 = vector.extract_strided_slice %1 {offsets = [1, 0], sizes = [1, 16], strides = [1, 1]} : vector<16x16xf32> to vector<1x16xf32>
    %c0_3 = arith.constant 0 : index
    %c1_4 = arith.constant 1 : index
    %4 = vector.load %arg7[%c0_3, %c1_4] : memref<18x18xf32, #tpu.memory_space<vmem>>, vector<1x16xf32>
    tpu.vector_store %arg7[%c0_3, %c1_4], %3 {strides = array<i32>} : memref<18x18xf32, #tpu.memory_space<vmem>>, vector<1x16xf32>,
    %5 = vector.extract_strided_slice %1 {offsets = [14, 0], sizes = [1, 16], strides = [1, 1]} : vector<16x16xf32> to vector<1x16xf32>
    %c17 = arith.constant 17 : index
    %c1_5 = arith.constant 1 : index
    %6 = vector.load %arg7[%c17, %c1_5] : memref<18x18xf32, #tpu.memory_space<vmem>>, vector<1x16xf32>
    tpu.vector_store %arg7[%c17, %c1_5], %5 {strides = array<i32>} : memref<18x18xf32, #tpu.memory_space<vmem>>, vector<1x16xf32>,
    %c0_6 = arith.constant 0 : index
    %c2 = arith.constant 2 : index
    %7 = vector.load %arg7[%c0_6, %c2] : memref<18x18xf32, #tpu.memory_space<vmem>>, vector<18x1xf32>
    %c0_7 = arith.constant 0 : index
    %c0_8 = arith.constant 0 : index
    %8 = vector.load %arg7[%c0_7, %c0_8] : memref<18x18xf32, #tpu.memory_space<vmem>>, vector<18x1xf32>
    tpu.vector_store %arg7[%c0_7, %c0_8], %7 {strides = array<i32>} : memref<18x18xf32, #tpu.memory_space<vmem>>, vector<18x1xf32>,
    %c0_9 = arith.constant 0 : index
    %c15 = arith.constant 15 : index
    %9 = vector.load %arg7[%c0_9, %c15] : memref<18x18xf32, #tpu.memory_space<vmem>>, vector<18x1xf32>
    %c0_10 = arith.constant 0 : index
    %c17_11 = arith.constant 17 : index
    %10 = vector.load %arg7[%c0_10, %c17_11] : memref<18x18xf32, #tpu.memory_space<vmem>>, vector<18x1xf32>
    tpu.vector_store %arg7[%c0_10, %c17_11], %9 {strides = array<i32>} : memref<18x18xf32, #tpu.memory_space<vmem>>, vector<18x1xf32>,
    %c0_12 = arith.constant 0 : index
    %c0_13 = arith.constant 0 : index
    %11 = vector.load %arg7[%c0_12, %c0_13] : memref<18x18xf32, #tpu.memory_space<vmem>>, vector<16x18xf32>
    %c1_14 = arith.constant 1 : index
    %c0_15 = arith.constant 0 : index
    %12 = vector.load %arg7[%c1_14, %c0_15] : memref<18x18xf32, #tpu.memory_space<vmem>>, vector<16x18xf32>
    %c2_16 = arith.constant 2 : index
    %c0_17 = arith.constant 0 : index
    %13 = vector.load %arg7[%c2_16, %c0_17] : memref<18x18xf32, #tpu.memory_space<vmem>>, vector<16x18xf32>
    %14 = arith.addf %11, %13 : vector<16x18xf32>
    %cst = arith.constant 2.000000e+00 : f32
    %15 = vector.broadcast %cst : f32 to vector<16x18xf32>
    %16 = arith.mulf %15, %12 : vector<16x18xf32>
    %17 = arith.addf %14, %16 : vector<16x18xf32>
    %18 = arith.subf %11, %13 : vector<16x18xf32>
    %19 = vector.extract_strided_slice %17 {offsets = [0, 0], sizes = [16, 16], strides = [1, 1]} : vector<16x18xf32> to vector<16x16xf32>
    %20 = vector.extract_strided_slice %17 {offsets = [0, 2], sizes = [16, 16], strides = [1, 1]} : vector<16x18xf32> to vector<16x16xf32>
    %21 = arith.subf %19, %20 : vector<16x16xf32>
    %22 = vector.extract_strided_slice %18 {offsets = [0, 0], sizes = [16, 16], strides = [1, 1]} : vector<16x18xf32> to vector<16x16xf32>
    %23 = vector.extract_strided_slice %18 {offsets = [0, 2], sizes = [16, 16], strides = [1, 1]} : vector<16x18xf32> to vector<16x16xf32>
    %24 = arith.addf %22, %23 : vector<16x16xf32>
    %25 = vector.extract_strided_slice %18 {offsets = [0, 1], sizes = [16, 16], strides = [1, 1]} : vector<16x18xf32> to vector<16x16xf32>
    %cst_18 = arith.constant 2.000000e+00 : f32
    %26 = vector.broadcast %cst_18 : f32 to vector<16x16xf32>
    %27 = arith.mulf %26, %25 : vector<16x16xf32>
    %28 = arith.addf %24, %27 : vector<16x16xf32>
    %29 = arith.mulf %21, %21 : vector<16x16xf32>
    %30 = arith.mulf %28, %28 : vector<16x16xf32>
    %31 = arith.addf %29, %30 : vector<16x16xf32>
    %32 = math.sqrt %31 : vector<16x16xf32>
    %33 = math.absf %21 : vector<16x16xf32>
    %cst_19 = arith.constant 0.000000e+00 : f32
    %34 = vector.broadcast %cst_19 : f32 to vector<16x16xf32>
    %35 = arith.cmpf ogt, %21, %34 : vector<16x16xf32>
    %cst_20 = arith.constant 0.000000e+00 : f32
    %36 = vector.broadcast %cst_20 : f32 to vector<16x16xf32>
    %37 = arith.subf %36, %28 : vector<16x16xf32>
    %38 = arith.select %35, %28, %37 : vector<16x16xi1>, vector<16x16xf32>
    %cst_21 = arith.constant 0.000000e+00 : f32
    %39 = vector.broadcast %cst_21 : f32 to vector<16x16xf32>
    %cst_22 = arith.constant 2.74747753 : f32
    %40 = vector.broadcast %cst_22 : f32 to vector<16x16xf32>
    %41 = arith.mulf %33, %40 : vector<16x16xf32>
    %42 = arith.cmpf ole, %38, %41 : vector<16x16xf32>
    %43 = arith.extui %42 : vector<16x16xi1> to vector<16x16xi32>
    %44 = arith.sitofp %43 : vector<16x16xi32> to vector<16x16xf32>
    %45 = arith.addf %39, %44 : vector<16x16xf32>
    %cst_23 = arith.constant 1.19175363 : f32
    %46 = vector.broadcast %cst_23 : f32 to vector<16x16xf32>
    %47 = arith.mulf %33, %46 : vector<16x16xf32>
    %48 = arith.cmpf ole, %38, %47 : vector<16x16xf32>
    %49 = arith.extui %48 : vector<16x16xi1> to vector<16x16xi32>
    %50 = arith.sitofp %49 : vector<16x16xi32> to vector<16x16xf32>
    %51 = arith.addf %45, %50 : vector<16x16xf32>
    %cst_24 = arith.constant 0.577350259 : f32
    %52 = vector.broadcast %cst_24 : f32 to vector<16x16xf32>
    %53 = arith.mulf %33, %52 : vector<16x16xf32>
    %54 = arith.cmpf ole, %38, %53 : vector<16x16xf32>
    %55 = arith.extui %54 : vector<16x16xi1> to vector<16x16xi32>
    %56 = arith.sitofp %55 : vector<16x16xi32> to vector<16x16xf32>
    %57 = arith.addf %51, %56 : vector<16x16xf32>
    %cst_25 = arith.constant 0.176326975 : f32
    %58 = vector.broadcast %cst_25 : f32 to vector<16x16xf32>
    %59 = arith.mulf %33, %58 : vector<16x16xf32>
    %60 = arith.cmpf ole, %38, %59 : vector<16x16xf32>
    %61 = arith.extui %60 : vector<16x16xi1> to vector<16x16xi32>
    %62 = arith.sitofp %61 : vector<16x16xi32> to vector<16x16xf32>
    %63 = arith.addf %57, %62 : vector<16x16xf32>
    %cst_26 = arith.constant -0.176326975 : f32
    %64 = vector.broadcast %cst_26 : f32 to vector<16x16xf32>
    %65 = arith.mulf %33, %64 : vector<16x16xf32>
    %66 = arith.cmpf ole, %38, %65 : vector<16x16xf32>
    %67 = arith.extui %66 : vector<16x16xi1> to vector<16x16xi32>
    %68 = arith.sitofp %67 : vector<16x16xi32> to vector<16x16xf32>
    %69 = arith.addf %63, %68 : vector<16x16xf32>
    %cst_27 = arith.constant -0.577350259 : f32
    %70 = vector.broadcast %cst_27 : f32 to vector<16x16xf32>
    %71 = arith.mulf %33, %70 : vector<16x16xf32>
    %72 = arith.cmpf ole, %38, %71 : vector<16x16xf32>
    %73 = arith.extui %72 : vector<16x16xi1> to vector<16x16xi32>
    %74 = arith.sitofp %73 : vector<16x16xi32> to vector<16x16xf32>
    %75 = arith.addf %69, %74 : vector<16x16xf32>
    %cst_28 = arith.constant -1.19175363 : f32
    %76 = vector.broadcast %cst_28 : f32 to vector<16x16xf32>
    %77 = arith.mulf %33, %76 : vector<16x16xf32>
    %78 = arith.cmpf ole, %38, %77 : vector<16x16xf32>
    %79 = arith.extui %78 : vector<16x16xi1> to vector<16x16xi32>
    %80 = arith.sitofp %79 : vector<16x16xi32> to vector<16x16xf32>
    %81 = arith.addf %75, %80 : vector<16x16xf32>
    %cst_29 = arith.constant -2.74747753 : f32
    %82 = vector.broadcast %cst_29 : f32 to vector<16x16xf32>
    %83 = arith.mulf %33, %82 : vector<16x16xf32>
    %84 = arith.cmpf ole, %38, %83 : vector<16x16xf32>
    %85 = arith.extui %84 : vector<16x16xi1> to vector<16x16xi32>
    %86 = arith.sitofp %85 : vector<16x16xi32> to vector<16x16xf32>
    %87 = arith.addf %81, %86 : vector<16x16xf32>
    %cst_30 = arith.constant 0.000000e+00 : f32
    %88 = vector.broadcast %cst_30 : f32 to vector<16x16xf32>
    %89 = arith.cmpf oeq, %21, %88 : vector<16x16xf32>
    %cst_31 = arith.constant 0.000000e+00 : f32
    %90 = vector.broadcast %cst_31 : f32 to vector<16x16xf32>
    %91 = arith.select %89, %90, %87 : vector<16x16xi1>, vector<16x16xf32>
    %92 = arith.truncf %32 : vector<16x16xf32> to vector<16x16xbf16>
    %cst_32 = arith.constant 0.000000e+00 : bf16
    %93 = vector.broadcast %cst_32 : bf16 to vector<16x16xbf16>
    %cst_33 = arith.constant 0.000000e+00 : f32
    %94 = vector.broadcast %cst_33 : f32 to vector<16x16xf32>
    %95 = arith.cmpf oeq, %91, %94 : vector<16x16xf32>
    %96 = arith.select %95, %92, %93 : vector<16x16xi1>, vector<16x16xbf16>
    %c0_34 = arith.constant 0 : index
    %c0_35 = arith.constant 0 : index
    %97 = vector.load %arg8[%c0_34, %c0_35] : memref<144x16xbf16, #tpu.memory_space<vmem>>, vector<16x16xbf16>
    tpu.vector_store %arg8[%c0_34, %c0_35], %96 {strides = array<i32>} : memref<144x16xbf16, #tpu.memory_space<vmem>>, vector<16x16xbf16>,
    %cst_36 = arith.constant 1.000000e+00 : f32
    %98 = vector.broadcast %cst_36 : f32 to vector<16x16xf32>
    %99 = arith.cmpf oeq, %91, %98 : vector<16x16xf32>
    %100 = arith.select %99, %92, %93 : vector<16x16xi1>, vector<16x16xbf16>
    %c16 = arith.constant 16 : index
    %c0_37 = arith.constant 0 : index
    %101 = vector.load %arg8[%c16, %c0_37] : memref<144x16xbf16, #tpu.memory_space<vmem>>, vector<16x16xbf16>
    tpu.vector_store %arg8[%c16, %c0_37], %100 {strides = array<i32>} : memref<144x16xbf16, #tpu.memory_space<vmem>>, vector<16x16xbf16>,
    %cst_38 = arith.constant 2.000000e+00 : f32
    %102 = vector.broadcast %cst_38 : f32 to vector<16x16xf32>
    %103 = arith.cmpf oeq, %91, %102 : vector<16x16xf32>
    %104 = arith.select %103, %92, %93 : vector<16x16xi1>, vector<16x16xbf16>
    %c32 = arith.constant 32 : index
    %c0_39 = arith.constant 0 : index
    %105 = vector.load %arg8[%c32, %c0_39] : memref<144x16xbf16, #tpu.memory_space<vmem>>, vector<16x16xbf16>
    tpu.vector_store %arg8[%c32, %c0_39], %104 {strides = array<i32>} : memref<144x16xbf16, #tpu.memory_space<vmem>>, vector<16x16xbf16>,
    %cst_40 = arith.constant 3.000000e+00 : f32
    %106 = vector.broadcast %cst_40 : f32 to vector<16x16xf32>
    %107 = arith.cmpf oeq, %91, %106 : vector<16x16xf32>
    %108 = arith.select %107, %92, %93 : vector<16x16xi1>, vector<16x16xbf16>
    %c48 = arith.constant 48 : index
    %c0_41 = arith.constant 0 : index
    %109 = vector.load %arg8[%c48, %c0_41] : memref<144x16xbf16, #tpu.memory_space<vmem>>, vector<16x16xbf16>
    tpu.vector_store %arg8[%c48, %c0_41], %108 {strides = array<i32>} : memref<144x16xbf16, #tpu.memory_space<vmem>>, vector<16x16xbf16>,
    %cst_42 = arith.constant 4.000000e+00 : f32
    %110 = vector.broadcast %cst_42 : f32 to vector<16x16xf32>
    %111 = arith.cmpf oeq, %91, %110 : vector<16x16xf32>
    %112 = arith.select %111, %92, %93 : vector<16x16xi1>, vector<16x16xbf16>
    %c64 = arith.constant 64 : index
    %c0_43 = arith.constant 0 : index
    %113 = vector.load %arg8[%c64, %c0_43] : memref<144x16xbf16, #tpu.memory_space<vmem>>, vector<16x16xbf16>
    tpu.vector_store %arg8[%c64, %c0_43], %112 {strides = array<i32>} : memref<144x16xbf16, #tpu.memory_space<vmem>>, vector<16x16xbf16>,
    %cst_44 = arith.constant 5.000000e+00 : f32
    %114 = vector.broadcast %cst_44 : f32 to vector<16x16xf32>
    %115 = arith.cmpf oeq, %91, %114 : vector<16x16xf32>
    %116 = arith.select %115, %92, %93 : vector<16x16xi1>, vector<16x16xbf16>
    %c80 = arith.constant 80 : index
    %c0_45 = arith.constant 0 : index
    %117 = vector.load %arg8[%c80, %c0_45] : memref<144x16xbf16, #tpu.memory_space<vmem>>, vector<16x16xbf16>
    tpu.vector_store %arg8[%c80, %c0_45], %116 {strides = array<i32>} : memref<144x16xbf16, #tpu.memory_space<vmem>>, vector<16x16xbf16>,
    %cst_46 = arith.constant 6.000000e+00 : f32
    %118 = vector.broadcast %cst_46 : f32 to vector<16x16xf32>
    %119 = arith.cmpf oeq, %91, %118 : vector<16x16xf32>
    %120 = arith.select %119, %92, %93 : vector<16x16xi1>, vector<16x16xbf16>
    %c96 = arith.constant 96 : index
    %c0_47 = arith.constant 0 : index
    %121 = vector.load %arg8[%c96, %c0_47] : memref<144x16xbf16, #tpu.memory_space<vmem>>, vector<16x16xbf16>
    tpu.vector_store %arg8[%c96, %c0_47], %120 {strides = array<i32>} : memref<144x16xbf16, #tpu.memory_space<vmem>>, vector<16x16xbf16>,
    %cst_48 = arith.constant 7.000000e+00 : f32
    %122 = vector.broadcast %cst_48 : f32 to vector<16x16xf32>
    %123 = arith.cmpf oeq, %91, %122 : vector<16x16xf32>
    %124 = arith.select %123, %92, %93 : vector<16x16xi1>, vector<16x16xbf16>
    %c112 = arith.constant 112 : index
    %c0_49 = arith.constant 0 : index
    %125 = vector.load %arg8[%c112, %c0_49] : memref<144x16xbf16, #tpu.memory_space<vmem>>, vector<16x16xbf16>
    tpu.vector_store %arg8[%c112, %c0_49], %124 {strides = array<i32>} : memref<144x16xbf16, #tpu.memory_space<vmem>>, vector<16x16xbf16>,
    %cst_50 = arith.constant 8.000000e+00 : f32
    %126 = vector.broadcast %cst_50 : f32 to vector<16x16xf32>
    %127 = arith.cmpf oeq, %91, %126 : vector<16x16xf32>
    %128 = arith.select %127, %92, %93 : vector<16x16xi1>, vector<16x16xbf16>
    %c128 = arith.constant 128 : index
    %c0_51 = arith.constant 0 : index
    %129 = vector.load %arg8[%c128, %c0_51] : memref<144x16xbf16, #tpu.memory_space<vmem>>, vector<16x16xbf16>
    tpu.vector_store %arg8[%c128, %c0_51], %128 {strides = array<i32>} : memref<144x16xbf16, #tpu.memory_space<vmem>>, vector<16x16xbf16>,
    %c0_52 = arith.constant 0 : index
    %c0_53 = arith.constant 0 : index
    %130 = vector.load %arg8[%c0_52, %c0_53] : memref<144x16xbf16, #tpu.memory_space<vmem>>, vector<144x16xbf16>
    %c0_54 = arith.constant 0 : index
    %c0_55 = arith.constant 0 : index
    %131 = vector.load %arg2[%c0_54, %c0_55] : memref<16x2xbf16, #tpu.memory_space<vmem>>, vector<16x2xbf16>
    %cst_56 = arith.constant dense<0.000000e+00> : vector<144x2xf32>
    %132 = tpu.matmul %130, %131, %cst_56 {dimension_numbers = #tpu.dot_dimension_numbers<[1], [0], [0], [1], [0, 0, 1, 1], [], []>} : vector<144x16xbf16>, vector<16x2xbf16>, vector<144x2xf32> -> vector<144x2xf32>
    %133 = vector.extract_strided_slice %132 {offsets = [0, 0], sizes = [16, 2], strides = [1, 1]} : vector<144x2xf32> to vector<16x2xf32>
    %134 = arith.truncf %133 : vector<16x2xf32> to vector<16x2xbf16>
    %c0_57 = arith.constant 0 : index
    %c0_58 = arith.constant 0 : index
    %135 = vector.load %arg9[%c0_57, %c0_58] : memref<16x18xbf16, #tpu.memory_space<vmem>>, vector<16x2xbf16>
    tpu.vector_store %arg9[%c0_57, %c0_58], %134 {strides = array<i32>} : memref<16x18xbf16, #tpu.memory_space<vmem>>, vector<16x2xbf16>,
    %136 = vector.extract_strided_slice %132 {offsets = [16, 0], sizes = [16, 2], strides = [1, 1]} : vector<144x2xf32> to vector<16x2xf32>
    %137 = arith.truncf %136 : vector<16x2xf32> to vector<16x2xbf16>
    %c0_59 = arith.constant 0 : index
    %c2_60 = arith.constant 2 : index
    %138 = vector.load %arg9[%c0_59, %c2_60] : memref<16x18xbf16, #tpu.memory_space<vmem>>, vector<16x2xbf16>
    tpu.vector_store %arg9[%c0_59, %c2_60], %137 {strides = array<i32>} : memref<16x18xbf16, #tpu.memory_space<vmem>>, vector<16x2xbf16>,
    %139 = vector.extract_strided_slice %132 {offsets = [32, 0], sizes = [16, 2], strides = [1, 1]} : vector<144x2xf32> to vector<16x2xf32>
    %140 = arith.truncf %139 : vector<16x2xf32> to vector<16x2xbf16>
    %c0_61 = arith.constant 0 : index
    %c4 = arith.constant 4 : index
    %141 = vector.load %arg9[%c0_61, %c4] : memref<16x18xbf16, #tpu.memory_space<vmem>>, vector<16x2xbf16>
    tpu.vector_store %arg9[%c0_61, %c4], %140 {strides = array<i32>} : memref<16x18xbf16, #tpu.memory_space<vmem>>, vector<16x2xbf16>,
    %142 = vector.extract_strided_slice %132 {offsets = [48, 0], sizes = [16, 2], strides = [1, 1]} : vector<144x2xf32> to vector<16x2xf32>
    %143 = arith.truncf %142 : vector<16x2xf32> to vector<16x2xbf16>
    %c0_62 = arith.constant 0 : index
    %c6 = arith.constant 6 : index
    %144 = vector.load %arg9[%c0_62, %c6] : memref<16x18xbf16, #tpu.memory_space<vmem>>, vector<16x2xbf16>
    tpu.vector_store %arg9[%c0_62, %c6], %143 {strides = array<i32>} : memref<16x18xbf16, #tpu.memory_space<vmem>>, vector<16x2xbf16>,
    %145 = vector.extract_strided_slice %132 {offsets = [64, 0], sizes = [16, 2], strides = [1, 1]} : vector<144x2xf32> to vector<16x2xf32>
    %146 = arith.truncf %145 : vector<16x2xf32> to vector<16x2xbf16>
    %c0_63 = arith.constant 0 : index
    %c8 = arith.constant 8 : index
    %147 = vector.load %arg9[%c0_63, %c8] : memref<16x18xbf16, #tpu.memory_space<vmem>>, vector<16x2xbf16>
    tpu.vector_store %arg9[%c0_63, %c8], %146 {strides = array<i32>} : memref<16x18xbf16, #tpu.memory_space<vmem>>, vector<16x2xbf16>,
    %148 = vector.extract_strided_slice %132 {offsets = [80, 0], sizes = [16, 2], strides = [1, 1]} : vector<144x2xf32> to vector<16x2xf32>
    %149 = arith.truncf %148 : vector<16x2xf32> to vector<16x2xbf16>
    %c0_64 = arith.constant 0 : index
    %c10 = arith.constant 10 : index
    %150 = vector.load %arg9[%c0_64, %c10] : memref<16x18xbf16, #tpu.memory_space<vmem>>, vector<16x2xbf16>
    tpu.vector_store %arg9[%c0_64, %c10], %149 {strides = array<i32>} : memref<16x18xbf16, #tpu.memory_space<vmem>>, vector<16x2xbf16>,
    %151 = vector.extract_strided_slice %132 {offsets = [96, 0], sizes = [16, 2], strides = [1, 1]} : vector<144x2xf32> to vector<16x2xf32>
    %152 = arith.truncf %151 : vector<16x2xf32> to vector<16x2xbf16>
    %c0_65 = arith.constant 0 : index
    %c12 = arith.constant 12 : index
    %153 = vector.load %arg9[%c0_65, %c12] : memref<16x18xbf16, #tpu.memory_space<vmem>>, vector<16x2xbf16>
    tpu.vector_store %arg9[%c0_65, %c12], %152 {strides = array<i32>} : memref<16x18xbf16, #tpu.memory_space<vmem>>, vector<16x2xbf16>,
    %154 = vector.extract_strided_slice %132 {offsets = [112, 0], sizes = [16, 2], strides = [1, 1]} : vector<144x2xf32> to vector<16x2xf32>
    %155 = arith.truncf %154 : vector<16x2xf32> to vector<16x2xbf16>
    %c0_66 = arith.constant 0 : index
    %c14 = arith.constant 14 : index
    %156 = vector.load %arg9[%c0_66, %c14] : memref<16x18xbf16, #tpu.memory_space<vmem>>, vector<16x2xbf16>
    tpu.vector_store %arg9[%c0_66, %c14], %155 {strides = array<i32>} : memref<16x18xbf16, #tpu.memory_space<vmem>>, vector<16x2xbf16>,
    %157 = vector.extract_strided_slice %132 {offsets = [128, 0], sizes = [16, 2], strides = [1, 1]} : vector<144x2xf32> to vector<16x2xf32>
    %158 = arith.truncf %157 : vector<16x2xf32> to vector<16x2xbf16>
    %c0_67 = arith.constant 0 : index
    %c16_68 = arith.constant 16 : index
    %159 = vector.load %arg9[%c0_67, %c16_68] : memref<16x18xbf16, #tpu.memory_space<vmem>>, vector<16x2xbf16>
    tpu.vector_store %arg9[%c0_67, %c16_68], %158 {strides = array<i32>} : memref<16x18xbf16, #tpu.memory_space<vmem>>, vector<16x2xbf16>,
    %c0_69 = arith.constant 0 : index
    %c0_70 = arith.constant 0 : index
    %160 = vector.load %arg3[%c0_69, %c0_70] : memref<2x16xbf16, #tpu.memory_space<vmem>>, vector<2x16xbf16>
    %c0_71 = arith.constant 0 : index
    %c0_72 = arith.constant 0 : index
    %161 = vector.load %arg9[%c0_71, %c0_72] : memref<16x18xbf16, #tpu.memory_space<vmem>>, vector<16x18xbf16>
    %cst_73 = arith.constant dense<0.000000e+00> : vector<2x18xf32>
    %162 = tpu.matmul %160, %161, %cst_73 {dimension_numbers = #tpu.dot_dimension_numbers<[1], [0], [0], [1], [0, 0, 1, 1], [], []>} : vector<2x16xbf16>, vector<16x18xbf16>, vector<2x18xf32> -> vector<2x18xf32>
    %c0_74 = arith.constant 0 : index
    %c0_75 = arith.constant 0 : index
    %163 = vector.load %arg4[%c0_74, %c0_75] : memref<16x2xbf16, #tpu.memory_space<vmem>>, vector<16x2xbf16>
    %164 = arith.truncf %162 : vector<2x18xf32> to vector<2x18xbf16>
    %cst_76 = arith.constant dense<0.000000e+00> : vector<16x18xf32>
    %165 = tpu.matmul %163, %164, %cst_76 {dimension_numbers = #tpu.dot_dimension_numbers<[1], [0], [0], [1], [0, 0, 1, 1], [], []>} : vector<16x2xbf16>, vector<2x18xbf16>, vector<16x18xf32> -> vector<16x18xf32>
    %166 = vector.extract_strided_slice %165 {offsets = [0, 0], sizes = [16, 2], strides = [1, 1]} : vector<16x18xf32> to vector<16x2xf32>
    %167 = arith.truncf %166 : vector<16x2xf32> to vector<16x2xbf16>
    %c0_77 = arith.constant 0 : index
    %c0_78 = arith.constant 0 : index
    %168 = vector.load %arg10[%c0_77, %c0_78] : memref<144x2xbf16, #tpu.memory_space<vmem>>, vector<16x2xbf16>
    tpu.vector_store %arg10[%c0_77, %c0_78], %167 {strides = array<i32>} : memref<144x2xbf16, #tpu.memory_space<vmem>>, vector<16x2xbf16>,
    %169 = vector.extract_strided_slice %165 {offsets = [0, 2], sizes = [16, 2], strides = [1, 1]} : vector<16x18xf32> to vector<16x2xf32>
    %170 = arith.truncf %169 : vector<16x2xf32> to vector<16x2xbf16>
    %c16_79 = arith.constant 16 : index
    %c0_80 = arith.constant 0 : index
    %171 = vector.load %arg10[%c16_79, %c0_80] : memref<144x2xbf16, #tpu.memory_space<vmem>>, vector<16x2xbf16>
    tpu.vector_store %arg10[%c16_79, %c0_80], %170 {strides = array<i32>} : memref<144x2xbf16, #tpu.memory_space<vmem>>, vector<16x2xbf16>,
    %172 = vector.extract_strided_slice %165 {offsets = [0, 4], sizes = [16, 2], strides = [1, 1]} : vector<16x18xf32> to vector<16x2xf32>
    %173 = arith.truncf %172 : vector<16x2xf32> to vector<16x2xbf16>
    %c32_81 = arith.constant 32 : index
    %c0_82 = arith.constant 0 : index
    %174 = vector.load %arg10[%c32_81, %c0_82] : memref<144x2xbf16, #tpu.memory_space<vmem>>, vector<16x2xbf16>
    tpu.vector_store %arg10[%c32_81, %c0_82], %173 {strides = array<i32>} : memref<144x2xbf16, #tpu.memory_space<vmem>>, vector<16x2xbf16>,
    %175 = vector.extract_strided_slice %165 {offsets = [0, 6], sizes = [16, 2], strides = [1, 1]} : vector<16x18xf32> to vector<16x2xf32>
    %176 = arith.truncf %175 : vector<16x2xf32> to vector<16x2xbf16>
    %c48_83 = arith.constant 48 : index
    %c0_84 = arith.constant 0 : index
    %177 = vector.load %arg10[%c48_83, %c0_84] : memref<144x2xbf16, #tpu.memory_space<vmem>>, vector<16x2xbf16>
    tpu.vector_store %arg10[%c48_83, %c0_84], %176 {strides = array<i32>} : memref<144x2xbf16, #tpu.memory_space<vmem>>, vector<16x2xbf16>,
    %178 = vector.extract_strided_slice %165 {offsets = [0, 8], sizes = [16, 2], strides = [1, 1]} : vector<16x18xf32> to vector<16x2xf32>
    %179 = arith.truncf %178 : vector<16x2xf32> to vector<16x2xbf16>
    %c64_85 = arith.constant 64 : index
    %c0_86 = arith.constant 0 : index
    %180 = vector.load %arg10[%c64_85, %c0_86] : memref<144x2xbf16, #tpu.memory_space<vmem>>, vector<16x2xbf16>
    tpu.vector_store %arg10[%c64_85, %c0_86], %179 {strides = array<i32>} : memref<144x2xbf16, #tpu.memory_space<vmem>>, vector<16x2xbf16>,
    %181 = vector.extract_strided_slice %165 {offsets = [0, 10], sizes = [16, 2], strides = [1, 1]} : vector<16x18xf32> to vector<16x2xf32>
    %182 = arith.truncf %181 : vector<16x2xf32> to vector<16x2xbf16>
    %c80_87 = arith.constant 80 : index
    %c0_88 = arith.constant 0 : index
    %183 = vector.load %arg10[%c80_87, %c0_88] : memref<144x2xbf16, #tpu.memory_space<vmem>>, vector<16x2xbf16>
    tpu.vector_store %arg10[%c80_87, %c0_88], %182 {strides = array<i32>} : memref<144x2xbf16, #tpu.memory_space<vmem>>, vector<16x2xbf16>,
    %184 = vector.extract_strided_slice %165 {offsets = [0, 12], sizes = [16, 2], strides = [1, 1]} : vector<16x18xf32> to vector<16x2xf32>
    %185 = arith.truncf %184 : vector<16x2xf32> to vector<16x2xbf16>
    %c96_89 = arith.constant 96 : index
    %c0_90 = arith.constant 0 : index
    %186 = vector.load %arg10[%c96_89, %c0_90] : memref<144x2xbf16, #tpu.memory_space<vmem>>, vector<16x2xbf16>
    tpu.vector_store %arg10[%c96_89, %c0_90], %185 {strides = array<i32>} : memref<144x2xbf16, #tpu.memory_space<vmem>>, vector<16x2xbf16>,
    %187 = vector.extract_strided_slice %165 {offsets = [0, 14], sizes = [16, 2], strides = [1, 1]} : vector<16x18xf32> to vector<16x2xf32>
    %188 = arith.truncf %187 : vector<16x2xf32> to vector<16x2xbf16>
    %c112_91 = arith.constant 112 : index
    %c0_92 = arith.constant 0 : index
    %189 = vector.load %arg10[%c112_91, %c0_92] : memref<144x2xbf16, #tpu.memory_space<vmem>>, vector<16x2xbf16>
    tpu.vector_store %arg10[%c112_91, %c0_92], %188 {strides = array<i32>} : memref<144x2xbf16, #tpu.memory_space<vmem>>, vector<16x2xbf16>,
    %190 = vector.extract_strided_slice %165 {offsets = [0, 16], sizes = [16, 2], strides = [1, 1]} : vector<16x18xf32> to vector<16x2xf32>
    %191 = arith.truncf %190 : vector<16x2xf32> to vector<16x2xbf16>
    %c128_93 = arith.constant 128 : index
    %c0_94 = arith.constant 0 : index
    %192 = vector.load %arg10[%c128_93, %c0_94] : memref<144x2xbf16, #tpu.memory_space<vmem>>, vector<16x2xbf16>
    tpu.vector_store %arg10[%c128_93, %c0_94], %191 {strides = array<i32>} : memref<144x2xbf16, #tpu.memory_space<vmem>>, vector<16x2xbf16>,
    %c0_95 = arith.constant 0 : index
    %c0_96 = arith.constant 0 : index
    %193 = vector.load %arg10[%c0_95, %c0_96] : memref<144x2xbf16, #tpu.memory_space<vmem>>, vector<144x2xbf16>
    %c0_97 = arith.constant 0 : index
    %c0_98 = arith.constant 0 : index
    %194 = vector.load %arg5[%c0_97, %c0_98] : memref<2x16xbf16, #tpu.memory_space<vmem>>, vector<2x16xbf16>
    %cst_99 = arith.constant dense<0.000000e+00> : vector<144x16xf32>
    %195 = tpu.matmul %193, %194, %cst_99 {dimension_numbers = #tpu.dot_dimension_numbers<[1], [0], [0], [1], [0, 0, 1, 1], [], []>} : vector<144x2xbf16>, vector<2x16xbf16>, vector<144x16xf32> -> vector<144x16xf32>
    %196 = arith.truncf %195 : vector<144x16xf32> to vector<144x16xbf16>
    %c0_100 = arith.constant 0 : index
    %c0_101 = arith.constant 0 : index
    %197 = vector.load %arg6[%c0_100, %c0_101] : memref<144x16xbf16, #tpu.memory_space<vmem>>, vector<144x16xbf16>
    tpu.vector_store %arg6[%c0_100, %c0_101], %196 {strides = array<i32>} : memref<144x16xbf16, #tpu.memory_space<vmem>>, vector<144x16xbf16>,
    return
  }
  func.func @transform_0(%arg0: i32) -> (i32, i32, i32) {
    %c0_i32 = arith.constant 0 : i32
    %c0_i32_0 = arith.constant 0 : i32
    %c0_i32_1 = arith.constant 0 : i32
    return %arg0, %c0_i32, %c0_i32_0 : i32, i32, i32
  }
  func.func @transform_1(%arg0: i32) -> (i32, i32) {
    %c0_i32 = arith.constant 0 : i32
    %c0_i32_0 = arith.constant 0 : i32
    %c0_i32_1 = arith.constant 0 : i32
    return %c0_i32, %c0_i32_0 : i32, i32
  }
  func.func @transform_2(%arg0: i32) -> (i32, i32) {
    %c0_i32 = arith.constant 0 : i32
    %c0_i32_0 = arith.constant 0 : i32
    %c0_i32_1 = arith.constant 0 : i32
    return %c0_i32, %c0_i32_0 : i32, i32
  }
  func.func @transform_3(%arg0: i32) -> (i32, i32) {
    %c0_i32 = arith.constant 0 : i32
    %c0_i32_0 = arith.constant 0 : i32
    %c0_i32_1 = arith.constant 0 : i32
    return %c0_i32, %c0_i32_0 : i32, i32
  }
  func.func @transform_4(%arg0: i32) -> (i32, i32) {
    %c0_i32 = arith.constant 0 : i32
    %c0_i32_0 = arith.constant 0 : i32
    %c0_i32_1 = arith.constant 0 : i32
    return %c0_i32, %c0_i32_0 : i32, i32
  }
  func.func @transform_5(%arg0: i32) -> (i32, i32) {
    %c0_i32 = arith.constant 0 : i32
    %c0_i32_0 = arith.constant 0 : i32
    return %arg0, %c0_i32 : i32, i32
  }
}

</mosaic_0001>

<bundles_post_ra>
// kernel: tpu_custom_call.1
= control target key start
LH: loop header
LB: loop body
LE: loop exit
PB: predicated region body
PF: predicated region fallthrough
CT: control target
= control target key end

     0   :  { %10 = vsyncpa [#allocation7], 0  ;;  %s2288_s0 = inlined_call_operand.hbm [shape: f32[2,16,16], index: 0, kind: input, shape index: {}]   ;;  %s2289_s1 = inlined_call_operand.vmem [shape: bf16[16,2], index: 1, kind: input, shape index: {}]   ;;  %s2290_s2 = inlined_call_operand.vmem [shape: bf16[2,16], index: 2, kind: input, shape index: {}]   ;;  %s2291_s3 = inlined_call_operand.vmem [shape: bf16[16,2], index: 3, kind: input, shape index: {}]   ;;  %s2292_s4 = inlined_call_operand.vmem [shape: bf16[2,16], index: 4, kind: input, shape index: {}]   ;;  %s2293_s5 = inlined_call_operand.vmem [shape: bf16[288,16], index: 5, kind: output, shape index: {}]  }
   0x1   :  { %12 = vsyncpa [#allocation7 + $0x1], 0  ;;  %s1934_s18 = smov 0   ;;  %s1936_s19 = smov 0  }
   0x2   :  { %s1938_s20 = smov 0   ;;  %s1940_s21 = smov 0  }
   0x3 LB: > { %s1455_s22 = sadd.s32 4294967295, %s1879_s21   ;;  %s1954_s23 = sadd.s32 1, %s1879_s21   ;;  %s1879_s21 = sphi %s1940_s21, %s2343_s21   ;;  %s1875_s20 = sphi %s1938_s20, %s2342_s20   ;;  %s1871_s19 = sphi %s1936_s19, %s2341_s19   ;;  %s1867_s18 = sphi %s1934_s18, %s2340_s18  }
   0x4   : > { %s22_s24 = ssub.s32 %s1879_s21, %s1954_s23  ;;  %s25_s25 = sadd.s32 1, %s1875_s20 }
   0x5   : > { %p23_p0 = scmp.eq.s32.totalorder %s22_s24, 0  ;;  %p32_p1 = scmp.ne.s32.totalorder %s1875_s20, %s1871_s19 }
   0x6   : > { %p33_p2 = scmp.eq.s32.totalorder %s1879_s21, 0  ;;  %p38_p3 = scmp.ne.s32.totalorder %s1871_s19, %s1867_s18 }
   0x7   : > { %s1964_s26 = scalar_select %p23_p0, %s1875_s20, %s25_s25  }
   0x8   : > { %p34_p4 = por %p33_p2, %p32_p1  ;;  %p39_p5 = scmp.eq.s32.totalorder %s1455_s22, 0 }
   0x9   : > { %p1737_p6 = scmp.lt.s32.totalorder %s1879_s21, 2  ;;  %s184_s28 = sand.u32 1, %s1875_s20  }
   0xa   : > { %p1969_p7 = por %p39_p5, %p38_p3  ;;  %s1459_s29 = sshll.u32 %s184_s28, 4 }
   0xb   : > { %s1580_s30 = sshll.u32 %s1879_s21, 8  ;;  %s188_s9 = scalar_lea.vmem [#allocation6], %s1459_s29 }
   0xc   : > { %s2297_s27 = scalar_select %p1969_p7, 1, 0 }
   0xd   : > { %s1978_s8 = scalar_lea.hbm %s2288_s0, %s1580_s30  ;;  %s195_s10 = sshll.u32 %s188_s9, 4  ;;  %s1980_s10 = int_to_ptr.vmem [resolvable:$true] %s195_s10 }
   0xe   : > { %p1982_p8 = pnand %p1737_p6, %p34_p4  ;;  %s1987_s12 = scalar_lea.sflag [#allocation7], %s184_s28 }
   0xf   : > { %s1817_s13 = scalar_lea.hbm %s1978_s8, 256  ;;  %s1822_s16 = scalar_lea.hbm %s2288_s0, 512 }
  0x10   : > { %p1818_p10 = scmp.ne.s32.totalorder %s1978_s8, %s1817_s13  ;;  %p1819_p11 = pneg %p1982_p8 }
  0x11   : > { %p1823_p0 = scmp.lt.s32.totalorder %s1978_s8, %s2288_s0  ;;  %p1824_p1 = scmp.lt.s32.totalorder %s1822_s16, %s1817_s13 }
  0x12   : > { %p1820_p12 = pnand %p1819_p11, %p1818_p10 }
  0x13   : > { %p1825_p2 = por %p1824_p1, %p1823_p0 }
  0x14   : > { %p1821_p13 = pneg %p1820_p12 }
  0x16   : > { %p1826_p3 = pnand %p1825_p2, %p1821_p13 }
  0x18   : > { %1829 = shalt.err (!%p1826_p3)
}
  0x19   : > { %s1830_s24 = scalar_lea.vmem %s1980_s10, 256  ;;  %s1881_s25 = smov [#allocation6]  }
  0x1a   : > { %p1831_p4 = scmp.ne.s32.totalorder %s1980_s10, %s1830_s24  ;;  %s1835_s28 = sshll.u32 %s1881_s25, 4  ;;  %s1836_s28 = int_to_ptr.vmem [resolvable:$false] %s1835_s28 }
  0x1b   : > { %s1837_s29 = scalar_lea.vmem %s1836_s28, 512  ;;  %p1838_p10 = scmp.lt.s32.totalorder %s1980_s10, %s1836_s28 }
  0x1c   : > { %p1833_p5 = pnand %p1831_p4, %p1819_p11  ;;  %p1839_p12 = scmp.lt.s32.totalorder %s1837_s29, %s1830_s24 }
  0x1e   : > { %p1834_p6 = pneg %p1833_p5  ;;  %p1840_p9 = por %p1839_p12, %p1838_p10 }
  0x20   : > { %p1841_p7 = pnand %p1840_p9, %p1834_p6 }
  0x22   : > { %1844 = shalt.err (!%p1841_p7)
}
  0x23   : > { %s1882_s30 = smov 128   ;;  %s1883_s6 = smov 8  }
  0x24   : > { %1736 = dma.hbm_to_vmem [thread:$0]  (!%p1982_p8), %s1978_s8, 256, %s1980_s10, %s1987_s12, %s1882_s30, %s1882_s30, %s1883_s6  }
  0x25   : > { %p203_p11 = scmp.lt.s32.totalorder %s1879_s21, 3  ;;  %p2299_p13 = scmp.ge.s32.totalorder %s1879_s21, 1 }
  0x27   : > { %p204_p0 = pnand %p2299_p13, %p203_p11 }
  0x28   : > { %s209_s7 = sand.u32 (!%p204_p0), 1, %s1871_s19   ;;  %p2300_p7 = scmp.ne.s32.totalorder (!%p204_p0), %s2297_s27, 0 }
  0x29   : > { %207 = sbr.rel (%p204_p0) target bundleno = 1761 (0x6e1), region = 40  ;;  %s1463_s9 = sshll.u32 (!%p204_p0), %s209_s7, 4 }
  0x2a   : > { %s210_s13 = scalar_lea.sflag (!%p204_p0), [#allocation7], %s209_s7  ;;  %s213_s14 = scalar_lea.vmem (!%p204_p0), [#allocation6], %s1463_s9 }
  0x2e   : > { %1862 = dma.done.wait (%p2300_p7), %s210_s13, 256  }
  0x2f   : > { %1864 = vsyncadd (%p2300_p7), %s210_s13, 4294967040  ;;  %v247_v0 = vld [vmem:[%s213_s14] sm:$0xff]  ;;  %s1884_s15 = smov 1   ;;  %v248_v1 = vld [vmem:[%s213_s14 + $0x8] sm:$0xff]  ;;  %vm257_vm0 = vcmask 138248   ;;  %vm260_vm1 = vcmask 132105  }
  0x30   : > { %251 = vrot.lane.b32.xlu0 %v247_v0, %s1884_s15  ;;  %vm262_vm2 = vcmask 137230   ;;  %s1885_s8 = smov 126   ;;  %vm279_vm3 = vcmask 7168   ;;  %vm282_vm4 = vcmask 1024   ;;  %s1886_s27 = smov 2   ;;  %vm299_vm5 = vcmask 146568  }
  0x31   : > { %vm302_vm6 = vcmask 140424   ;;  %v1887_v17 = vmov 0.0   ;;  %s1888_s10 = smov 127   ;;  %v1792_v33 = vld [vmem:[%s2289_s1] sm:$0xff]   ;;  %vm2295_vm7 = vmmov 0   ;;  %s1890_s16 = smov 4  }
  0x32   : > { %1643 = vmatprep.subr.bf16.mxu0 %v1887_v17  ;;  %1687 = vmatprep.subr.bf16.mxu1 %v1887_v17  ;;  %s1891_s17 = smov 6   ;;  %s1892_s18 = smov 8  }
  0x33   : > { %1645 = vmatprep.mubr.msk.bf16.mxu0 %vm2295_vm7, %v1887_v17  ;;  %1689 = vmatprep.mubr.msk.bf16.mxu1 %vm2295_vm7, %v1887_v17  ;;  %vm2303_vm7 = vcmask 125952   ;;  %s1893_s24 = smov 10   ;;  %s1894_s25 = smov 12  }
  0x34   : > { %253 = vrot.lane.b32.xlu0 %v248_v1, %s1884_s15  ;;  %1644 = vmatpush3.bf16.msra.mxu0 %v1792_v33  ;;  %s1895_s28 = smov 14   ;;  %s1896_s29 = smov 16  }
  0x35   : > { %1681 = vmatprep.subr.bf16.mxu0 %v1887_v17  ;;  %s1897_s15 = smov 124   ;;  %s1900_s11 = smov 118  }
  0x36   : > { %s1901_s12 = smov 116  }
  0xa2   : > { %v252_v2 = vpop.permute.xlu0 %251 }
  0xa3   : > { %258 = vst.msk [vmem:[#allocation2 + $0x1] sm:$0xff] %vm257_vm0, %v252_v2 }
  0xa4   : > { %261 = vst.msk [vmem:[#allocation2 - $0x1] sm:$0x2] %vm260_vm1, %v252_v2 }
  0xa6   : > { %v254_v3 = vpop.permute.xlu0 %253 }
  0xa7   : > { %259 = vst.msk [vmem:[#allocation2 + $0x9] sm:$0xff] %vm257_vm0, %v254_v3 }
  0xa8   : > { %263 = vst.msk [vmem:[#allocation2 + $0xb] sm:$0x40] %vm262_vm2, %v254_v3 }
  0xab   : > { %v264_v4 = vld [vmem:[#allocation2] sm:$0xff] }
  0xac   : > { %270 = vrot.lane.b32.xlu1 %v264_v4, %s1885_s8 }
  0xae   : > { %v265_v6 = vld [vmem:[#allocation2 + $0x8] sm:$0xff] }
  0xaf   : > { %v266_v5 = vld [vmem:[#allocation2 + $0x10] sm:$0x3] }
  0xb0   : > { %274 = vrot.lane.b32.xlu0 %v266_v5, %s1885_s8  ;;  %272 = vrot.lane.b32.xlu1 %v265_v6, %s1885_s8 }
 0x11e   : > { %v271_v7 = vpop.permute.xlu1 %270 }
 0x11f   : > { %280 = vst.msk [vmem:[#allocation2] sm:$0xff] %vm279_vm3, %v271_v7 }
 0x122   : > { %v275_v8 = vpop.permute.xlu0 %274  ;;  %v273_v9 = vpop.permute.xlu1 %272 }
 0x123   : > { %283 = vst.msk [vmem:[#allocation2 + $0x10] sm:$0x3] %vm282_vm4, %v275_v8 }
 0x124   : > { %281 = vst.msk [vmem:[#allocation2 + $0x8] sm:$0xff] %vm279_vm3, %v273_v9 }
 0x126   : > { %v284_v10 = vld [vmem:[#allocation2] sm:$0xff] }
 0x127   : > { %290 = vrot.lane.b32.xlu1 %v284_v10, %s1886_s27 }
 0x12a   : > { %v286_v11 = vld [vmem:[#allocation2 + $0x10] sm:$0x3] }
 0x12b   : > { %v285_v12 = vld [vmem:[#allocation2 + $0x8] sm:$0xff]  ;;  %294 = vrot.lane.b32.xlu1 %v286_v11, %s1886_s27 }
 0x12c   : > { %292 = vrot.lane.b32.xlu0 %v285_v12, %s1886_s27 }
 0x199   : > { %v291_v13 = vpop.permute.xlu1 %290 }
 0x19a   : > { %300 = vst.msk [vmem:[#allocation2] sm:$0xff] %vm299_vm5, %v291_v13 }
 0x19d   : > { %v295_v15 = vpop.permute.xlu1 %294 }
 0x19e   : > { %v293_v14 = vpop.permute.xlu0 %292  ;;  %303 = vst.msk [vmem:[#allocation2 + $0x10] sm:$0x3] %vm302_vm6, %v295_v15 }
 0x19f   : > { %301 = vst.msk [vmem:[#allocation2 + $0x8] sm:$0xff] %vm299_vm5, %v293_v14 }
 0x1a1   : > { %v304_v16 = vld [vmem:[#allocation2] sm:$0xff] }
 0x1a6   : > { %v308_v18 = vld [vmem:[#allocation2 + $0x2] sm:$0xff]  ;;  %v309_v20 = vld [vmem:[#allocation2 + $0xa] sm:$0xff] }
 0x1a7   : > { %v305_v19 = vld [vmem:[#allocation2 + $0x8] sm:$0xff]  ;;  %v316_v21 = vsub.f32 %v304_v16, %v308_v18  ;;  %v310_v24 = vadd.f32 %v308_v18, %v304_v16 }
 0x1a8   : > { %v317_v22 = vsub.f32 %v305_v19, %v309_v20  ;;  %v306_v23 = vld [vmem:[#allocation2 + $0x1] sm:$0xff]  ;;  %v307_v25 = vld [vmem:[#allocation2 + $0x9] sm:$0xff]  ;;  %v311_v26 = vadd.f32 %v309_v20, %v305_v19 }
 0x1a9   : > { %v312_v27 = vmul.f32 2.0, %v306_v23  ;;  %v313_v28 = vmul.f32 2.0, %v307_v25  ;;  %330 = vrot.lane.b32.xlu0 %v316_v21, %s1885_s8  ;;  %v338_v31 = vmul.f32 2.0, %v316_v21 }
 0x1aa   : > { %332 = vrot.lane.b32.xlu1 %v317_v22, %s1885_s8  ;;  %v339_v32 = vmul.f32 2.0, %v317_v22 }
 0x1ab   : > { %v314_v29 = vadd.f32 %v312_v27, %v310_v24  ;;  %v315_v30 = vadd.f32 %v313_v28, %v311_v26 }
 0x1ad   : > { %320 = vrot.lane.b32.xlu0 %v314_v29, %s1885_s8 }
 0x1ae   : > { %322 = vrot.lane.b32.xlu1 %v315_v30, %s1885_s8 }
 0x1b1   : > { %342 = vrot.lane.b32.xlu0 %v338_v31, %s1888_s10 }
 0x1b2   : > { %344 = vrot.lane.b32.xlu1 %v339_v32, %s1888_s10  ;;  %s1899_s10 = smov 120  }
 0x21b   : > { %v331_v34 = vpop.permute.xlu0 %330 }
 0x21c   : > { %v333_v35 = vpop.permute.xlu1 %332  ;;  %v336_v39 = vadd.f32 %v331_v34, %v316_v21 }
 0x21d   : > { %v337_v44 = vadd.f32 %v333_v35, %v317_v22 }
 0x21f   : > { %v321_v36 = vpop.permute.xlu0 %320 }
 0x220   : > { %v323_v37 = vpop.permute.xlu1 %322  ;;  %v2036_v38 = vsub.f32 %v314_v29, %v321_v36 }
 0x221   : > { %v2042_v51 = vsub.f32 %v315_v30, %v323_v37 }
 0x222   : > { %v370_v40 = vand.u32 2147483647, %v2036_v38  ;;  %v350_v45 = vmul.f32 %v2036_v38, %v2036_v38  ;;  %vm372_vm8 = vcmp.gt.f32.partialorder %v2036_v38, 0.0 }
 0x223   : > { %v343_v41 = vpop.permute.xlu0 %342  ;;  %v371_v59 = vand.u32 2147483647, %v2042_v51  ;;  %v351_v62 = vmul.f32 %v2042_v51, %v2042_v51  ;;  %vm373_vm14 = vcmp.gt.f32.partialorder %v2042_v51, 0.0 }
 0x224   : > { %v348_v42 = vadd.f32 %v343_v41, %v336_v39  ;;  %v345_v43 = vpop.permute.xlu1 %344  ;;  %v378_v48 = vmul.f32 2.7474775, %v370_v40  ;;  %v388_v49 = vmul.f32 1.1917536, %v370_v40  ;;  %v398_v52 = vmul.f32 0.57735026, %v370_v40 }
 0x225   : > { %v349_v50 = vadd.f32 %v345_v43, %v337_v44  ;;  %v408_v55 = vmul.f32 0.17632698, %v370_v40  ;;  %v418_v60 = vmul.f32 -0.17632698, %v370_v40  ;;  %v428_v1 = vmul.f32 -0.57735026, %v370_v40 }
 0x226   : > { %v352_v46 = vmul.f32 %v348_v42, %v348_v42  ;;  %v374_v47 = vsub.f32 0.0, %v348_v42  ;;  %v379_v6 = vmul.f32 2.7474775, %v371_v59  ;;  %v389_v7 = vmul.f32 1.1917536, %v371_v59 }
 0x227   : > { %v353_v58 = vmul.f32 %v349_v50, %v349_v50  ;;  %v375_v4 = vsub.f32 0.0, %v349_v50  ;;  %v399_v9 = vmul.f32 0.57735026, %v371_v59  ;;  %v438_v10 = vmul.f32 -1.1917536, %v370_v40 }
 0x228   : > { %v2044_v53 = vadd.f32 %v352_v46, %v350_v45  ;;  %v376_v54 = vsel %vm372_vm8, %v348_v42, %v374_v47  ;;  %v409_v13 = vmul.f32 0.17632698, %v371_v59  ;;  %v448_v20 = vmul.f32 -2.7474775, %v370_v40 }
 0x229   : > { %vm380_vm9 = vcmp.le.f32.partialorder %v376_v54, %v378_v48  ;;  %vm390_vm10 = vcmp.le.f32.partialorder %v376_v54, %v388_v49  ;;  %vm400_vm11 = vcmp.le.f32.partialorder %v376_v54, %v398_v52  ;;  %vm410_vm12 = vcmp.le.f32.partialorder %v376_v54, %v408_v55 }
 0x22a   : > { %1813 = vrsqrt.f32 %v2044_v53  ;;  %v1465_v56 = vsel %vm380_vm9, 1.0, %v1887_v17  ;;  %v1467_v57 = vsel %vm390_vm10, 1.0, %v1887_v17  ;;  %v1469_v63 = vsel %vm400_vm11, 1.0, %v1887_v17 }
 0x22b   : > { %v396_v61 = vadd.f32 %v1467_v57, %v1465_v56  ;;  %vm420_vm13 = vcmp.le.f32.partialorder %v376_v54, %v418_v60  ;;  %v1471_v2 = vsel %vm410_vm12, 1.0, %v1887_v17  ;;  %v2054_v3 = vadd.f32 %v353_v58, %v351_v62 }
 0x22c   : > { %v1473_v8 = vsel %vm420_vm13, 1.0, %v1887_v17  ;;  %vm430_vm15 = vcmp.le.f32.partialorder %v376_v54, %v428_v1  ;;  %v377_v12 = vsel %vm373_vm14, %v349_v50, %v375_v4  ;;  %vm440_vm3 = vcmp.le.f32.partialorder %v376_v54, %v438_v10 }
 0x22d   : > { %v406_v0 = vadd.f32 %v1469_v63, %v396_v61  ;;  %1815 = vrsqrt.f32 %v2054_v3  ;;  %vm381_vm0 = vcmp.le.f32.partialorder %v377_v12, %v379_v6  ;;  %vm391_vm1 = vcmp.le.f32.partialorder %v377_v12, %v389_v7 }
 0x22e   : > { %vm401_vm2 = vcmp.le.f32.partialorder %v377_v12, %v399_v9  ;;  %v1475_v14 = vsel %vm430_vm15, 1.0, %v1887_v17  ;;  %v1466_v15 = vsel %vm381_vm0, 1.0, %v1887_v17  ;;  %v1468_v16 = vsel %vm391_vm1, 1.0, %v1887_v17 }
 0x22f   : > { %v416_v5 = vadd.f32 %v1471_v2, %v406_v0  ;;  %v397_v19 = vadd.f32 %v1468_v16, %v1466_v15  ;;  %vm411_vm4 = vcmp.le.f32.partialorder %v377_v12, %v409_v13  ;;  %v1470_v21 = vsel %vm401_vm2, 1.0, %v1887_v17 }
 0x230   : > { %v419_v23 = vmul.f32 -0.17632698, %v371_v59  ;;  %v1477_v25 = vsel %vm440_vm3, 1.0, %v1887_v17  ;;  %vm450_vm5 = vcmp.le.f32.partialorder %v376_v54, %v448_v20  ;;  %v1472_v26 = vsel %vm411_vm4, 1.0, %v1887_v17 }
 0x231   : > { %v426_v11 = vadd.f32 %v1473_v8, %v416_v5  ;;  %v407_v24 = vadd.f32 %v1470_v21, %v397_v19  ;;  %v429_v28 = vmul.f32 -0.57735026, %v371_v59  ;;  %v439_v31 = vmul.f32 -1.1917536, %v371_v59 }
 0x232   : > { %vm421_vm6 = vcmp.le.f32.partialorder %v377_v12, %v419_v23  ;;  %vm358_vm9 = vcmp.eq.f32.partialorder %v2044_v53, inf  ;;  %v1479_v32 = vsel %vm450_vm5, 1.0, %v1887_v17  ;;  %v449_v35 = vmul.f32 -2.7474775, %v371_v59 }
 0x233   : > { %v436_v18 = vadd.f32 %v1475_v14, %v426_v11  ;;  %v417_v29 = vadd.f32 %v1472_v26, %v407_v24  ;;  %vm431_vm8 = vcmp.le.f32.partialorder %v377_v12, %v429_v28  ;;  %v1474_v33 = vsel %vm421_vm6, 1.0, %v1887_v17 }
 0x234   : > { %vm441_vm10 = vcmp.le.f32.partialorder %v377_v12, %v439_v31  ;;  %vm458_vm11 = vcmp.eq.f32.partialorder %v2036_v38, 0.0  ;;  %vm360_vm12 = vcmp.eq.f32.partialorder %v2044_v53, 0.0  ;;  %v1476_v40 = vsel %vm431_vm8, 1.0, %v1887_v17 }
 0x235   : > { %v446_v27 = vadd.f32 %v1477_v25, %v436_v18  ;;  %v427_v36 = vadd.f32 %v1474_v33, %v417_v29  ;;  %v361_v41 = vand.u32 2147483648, %v2044_v53  ;;  %vm451_vm13 = vcmp.le.f32.partialorder %v377_v12, %v449_v35 }
 0x236   : > { %vm365_vm14 = vcmp.eq.f32.partialorder %v2054_v3, inf  ;;  %vm367_vm15 = vcmp.eq.f32.partialorder %v2054_v3, 0.0  ;;  %v368_v44 = vand.u32 2147483648, %v2054_v3  ;;  %v1478_v38 = vsel %vm441_vm10, 1.0, %v1887_v17 }
 0x237   : > { %v1814_v22 = vpop.eup %1813  ;;  %v456_v34 = vadd.f32 %v1479_v32, %v446_v27  ;;  %v437_v43 = vadd.f32 %v1476_v40, %v427_v36  ;;  %v1480_v50 = vsel %vm451_vm13, 1.0, %v1887_v17  ;;  %vm459_vm0 = vcmp.eq.f32.partialorder %v2042_v51, 0.0 }
 0x238   : > { %v357_v30 = vmul.f32 %v1814_v22, %v2044_v53 }
 0x239   : > { %v2079_v46 = vsel %vm458_vm11, 0.0, %v456_v34  ;;  %v447_v48 = vadd.f32 %v1478_v38, %v437_v43 }
 0x23a   : > { %v1816_v37 = vpop.eup %1815  ;;  %v359_v39 = vsel %vm358_vm9, %v2044_v53, %v357_v30  ;;  %vm463_vm1 = vcmp.eq.f32.partialorder %v2079_v46, 0.0  ;;  %vm477_vm2 = vcmp.eq.f32.partialorder %v2079_v46, 1.0  ;;  %vm490_vm3 = vcmp.eq.f32.partialorder %v2079_v46, 2.0 }
 0x23b   : > { %v364_v42 = vmul.f32 %v1816_v37, %v2054_v3  ;;  %v362_v45 = vsel %vm360_vm12, %v361_v41, %v359_v39  ;;  %v457_v52 = vadd.f32 %v1480_v50, %v447_v48  ;;  %vm529_vm11 = vcmp.eq.f32.partialorder %v2079_v46, 5.0 }
 0x23c   : > { %vm542_vm12 = vcmp.eq.f32.partialorder %v2079_v46, 6.0 }
 0x23d   : > { %v366_v47 = vsel %vm365_vm14, %v2054_v3, %v364_v42  ;;  %v461_v54 = vsel %vm459_vm0, 0.0, %v457_v52 }
 0x23e   : > { %v369_v49 = vsel %vm367_vm15, %v368_v44, %v366_v47  ;;  %vm464_vm6 = vcmp.eq.f32.partialorder %v461_v54, 0.0  ;;  %vm478_vm8 = vcmp.eq.f32.partialorder %v461_v54, 1.0  ;;  %vm491_vm9 = vcmp.eq.f32.partialorder %v461_v54, 2.0 }
 0x23f   : > { %v2085_v53 = vpack.c.bf16 %v369_v49, %v362_v45  ;;  %vm465_vm13 = vmpackc.low %vm464_vm6, %vm463_vm1  ;;  %vm504_vm14 = vcmp.eq.f32.partialorder %v461_v54, 3.0  ;;  %vm517_vm4 = vcmp.eq.f32.partialorder %v461_v54, 4.0  ;;  %vm530_vm10 = vcmp.eq.f32.partialorder %v461_v54, 5.0 }
 0x240   : > { %vm479_vm0 = vmpackc.low %vm478_vm8, %vm477_vm2  ;;  %vm2301_vm1 = vcmp.eq.f32.partialorder %v2079_v46, 3.0  ;;  %vm543_vm15 = vcmp.eq.f32.partialorder %v461_v54, 6.0  ;;  %vm2302_vm2 = vcmp.eq.f32.partialorder %v2079_v46, 4.0 }
 0x241   : > { %v466_v51 = vsel %vm465_vm13, %v2085_v53, 0  ;;  %vm492_vm5 = vmpackc.low %vm491_vm9, %vm490_vm3  ;;  %v480_v57 = vsel %vm479_vm0, %v2085_v53, 0  ;;  %vm556_vm13 = vcmp.eq.f32.partialorder %v461_v54, 7.0 }
 0x242   : > { %v1481_v55 = vcombine.low %v466_v51, %v466_v51  ;;  %v1482_v56 = vcombine.high %v466_v51, %v466_v51  ;;  %vm505_vm6 = vmpackc.low %vm504_vm14, %vm2301_vm1  ;;  %v1483_v58 = vcombine.low %v480_v57, %v480_v57  ;;  %v1484_v59 = vcombine.high %v480_v57, %v480_v57 }
 0x243   : > { %v493_v60 = vsel %vm492_vm5, %v2085_v53, 0  ;;  %vm518_vm8 = vmpackc.low %vm517_vm4, %vm2302_vm2  ;;  %v506_v63 = vsel %vm505_vm6, %v2085_v53, 0  ;;  %vm569_vm14 = vcmp.eq.f32.partialorder %v461_v54, 8.0 }
 0x244   : > { %475 = vst.msk [vmem:[#allocation3] sm:$0xf] %vm2303_vm7, %v1481_v55  ;;  %vm2304_vm3 = vmmov %vm2303_vm7  ;;  %v1485_v61 = vcombine.low %v493_v60, %v493_v60  ;;  %v1486_v62 = vcombine.high %v493_v60, %v493_v60  ;;  %v1487_v0 = vcombine.low %v506_v63, %v506_v63  ;;  %v1488_v1 = vcombine.high %v506_v63, %v506_v63 }
 0x245   : > { %476 = vst.msk [vmem:[#allocation3 + $0x4] sm:$0xf] %vm2304_vm3, %v1482_v56  ;;  %vm531_vm9 = vmpackc.low %vm530_vm10, %vm529_vm11  ;;  %v519_v2 = vsel %vm518_vm8, %v2085_v53, 0  ;;  %vm2309_vm10 = vcmp.eq.f32.partialorder %v2079_v46, 7.0 }
 0x246   : > { %vm2305_vm0 = vmmov %vm2304_vm3  ;;  %v1489_v3 = vcombine.low %v519_v2, %v519_v2  ;;  %v1490_v4 = vcombine.high %v519_v2, %v519_v2  ;;  %v532_v5 = vsel %vm531_vm9, %v2085_v53, 0 }
 0x247   : > { %488 = vst.msk [vmem:[#allocation3 + $0x8] sm:$0xf] %vm2305_vm0, %v1483_v58  ;;  %vm2306_vm5 = vmmov %vm2305_vm0  ;;  %v1491_v6 = vcombine.low %v532_v5, %v532_v5  ;;  %v1492_v7 = vcombine.high %v532_v5, %v532_v5 }
 0x248   : > { %489 = vst.msk [vmem:[#allocation3 + $0xc] sm:$0xf] %vm2306_vm5, %v1484_v59  ;;  %vm544_vm7 = vmpackc.low %vm543_vm15, %vm542_vm12  ;;  %vm2312_vm12 = vcmp.eq.f32.partialorder %v2079_v46, 8.0 }
 0x249   : > { %vm2307_vm4 = vmmov %vm2305_vm0  ;;  %v545_v8 = vsel %vm544_vm7, %v2085_v53, 0 }
 0x24a   : > { %501 = vst.msk [vmem:[#allocation3 + $0x10] sm:$0xf] %vm2307_vm4, %v1485_v61  ;;  %vm2308_vm1 = vmmov %vm2305_vm0  ;;  %v1493_v9 = vcombine.low %v545_v8, %v545_v8  ;;  %v1494_v10 = vcombine.high %v545_v8, %v545_v8 }
 0x24b   : > { %502 = vst.msk [vmem:[#allocation3 + $0x14] sm:$0xf] %vm2308_vm1, %v1486_v62  ;;  %vm557_vm11 = vmpackc.low %vm556_vm13, %vm2309_vm10 }
 0x24c   : > { %vm2310_vm6 = vmmov %vm2305_vm0  ;;  %v558_v11 = vsel %vm557_vm11, %v2085_v53, 0  ;;  %v1793_v18 = vld [vmem:[#allocation3] sm:$0xff]   ;;  %vm2322_vm11 = vmmov 0  }
 0x24d   : > { %514 = vst.msk [vmem:[#allocation3 + $0x18] sm:$0xf] %vm2310_vm6, %v1487_v0  ;;  %vm2311_vm2 = vmmov %vm2305_vm0  ;;  %v1495_v12 = vcombine.low %v558_v11, %v558_v11  ;;  %v1496_v13 = vcombine.high %v558_v11, %v558_v11  ;;  %vm793_vm6 = vcmask 11264  }
 0x24e   : > { %515 = vst.msk [vmem:[#allocation3 + $0x1c] sm:$0xf] %vm2311_vm2, %v1488_v1  ;;  %vm570_vm15 = vmpackc.low %vm569_vm14, %vm2312_vm12  ;;  %vm808_vm2 = vcmask 27664   ;;  %vm823_vm12 = vcmask 44064  }
 0x24f   : > { %vm2313_vm8 = vmmov %vm2305_vm0  ;;  %v571_v14 = vsel %vm570_vm15, %v2085_v53, 0  ;;  %v1794_v19 = vld [vmem:[#allocation3 + $0x8] sm:$0xff]   ;;  %vm838_vm15 = vcmask 60464  }
 0x250   : > { %527 = vst.msk [vmem:[#allocation3 + $0x20] sm:$0xf] %vm2313_vm8, %v1489_v3  ;;  %vm2314_vm3 = vmmov %vm2305_vm0  ;;  %v1497_v15 = vcombine.low %v571_v14, %v571_v14  ;;  %v1498_v16 = vcombine.high %v571_v14, %v571_v14  ;;  %vm853_vm8 = vcmask 76864  }
 0x251   : > { %528 = vst.msk [vmem:[#allocation3 + $0x24] sm:$0xf] %vm2314_vm3, %v1490_v4  ;;  %vm2315_vm13 = vmmov %vm2305_vm0  ;;  %vm868_vm3 = vcmask 93264  }
 0x252   : > { %540 = vst.msk [vmem:[#allocation3 + $0x28] sm:$0xf] %vm2315_vm13, %v1491_v6  ;;  %vm2316_vm9 = vmmov %vm2305_vm0  ;;  %vm652_vm0 = vcmask 130048   ;;  %v1795_v20 = vld [vmem:[#allocation3 + $0x10] sm:$0xff]   ;;  %vm883_vm13 = vcmask 109664  }
 0x253   : > { %541 = vst.msk [vmem:[#allocation3 + $0x2c] sm:$0xf] %vm2316_vm9, %v1492_v7  ;;  %vm2317_vm5 = vmmov %vm2308_vm1  ;;  %1646 = vmatmul.mubr.msk.bf16.vlgmr.msra.gmra.mxu0 %vm652_vm0, %v1793_v18  ;;  %vm898_vm9 = vcmask 126064  }
 0x254   : > { %553 = vst.msk [vmem:[#allocation3 + $0x30] sm:$0xf] %vm2317_vm5, %v1493_v9  ;;  %vm2318_vm14 = vmmov %vm2308_vm1  ;;  %1649 = vmatprep.mubr.msk.bf16.mxu0 %vm2322_vm11, %v1887_v17  ;;  %vm913_vm5 = vcmask 142464  }
 0x255   : > { %554 = vst.msk [vmem:[#allocation3 + $0x34] sm:$0xf] %vm2318_vm14, %v1494_v10  ;;  %vm2319_vm7 = vmmov %vm2308_vm1  ;;  %v1796_v21 = vld [vmem:[#allocation3 + $0x18] sm:$0xff]   ;;  %vm980_vm14 = vcmask 1040384  }
 0x256   : > { %566 = vst.msk [vmem:[#allocation3 + $0x38] sm:$0xf] %vm2319_vm7, %v1495_v12  ;;  %vm2320_vm4 = vmmov %vm2308_vm1  ;;  %vm976_vm7 = vcmask 15360  }
 0x257   : > { %567 = vst.msk [vmem:[#allocation3 + $0x3c] sm:$0xf] %vm2320_vm4, %v1496_v13  ;;  %vm2321_vm10 = vmmov %vm2308_vm1 }
 0x258   : > { %579 = vst.msk [vmem:[#allocation3 + $0x40] sm:$0xf] %vm2308_vm1, %v1497_v15  ;;  %v1797_v22 = vld [vmem:[#allocation3 + $0x20] sm:$0xff]  }
 0x259   : > { %580 = vst.msk [vmem:[#allocation3 + $0x44] sm:$0xf] %vm2321_vm10, %v1498_v16 }
 0x25a   : > { %v1798_v23 = vld [vmem:[#allocation3 + $0x28] sm:$0xff]  }
 0x25b   : > { %1650 = vmatmul.mubr.msk.bf16.gmra.mxu0 %vm652_vm0, %v1794_v19 }
 0x25c   : > { %1653 = vmatprep.mubr.msk.bf16.mxu0 %vm2322_vm11, %v1887_v17  ;;  %v1799_v24 = vld [vmem:[#allocation3 + $0x30] sm:$0xff]  }
 0x25e   : > { %v1800_v25 = vld [vmem:[#allocation3 + $0x38] sm:$0xff]  }
 0x260   : > { %v1801_v26 = vld [vmem:[#allocation3 + $0x40] sm:$0xff]  }
 0x263   : > { %1654 = vmatmul.mubr.msk.bf16.gmra.mxu0 %vm652_vm0, %v1795_v20 }
 0x264   : > { %1657 = vmatprep.mubr.msk.bf16.mxu0 %vm2322_vm11, %v1887_v17 }
 0x26b   : > { %1658 = vmatmul.mubr.msk.bf16.gmra.mxu0 %vm652_vm0, %v1796_v21 }
 0x26c   : > { %1661 = vmatprep.mubr.msk.bf16.mxu0 %vm2322_vm11, %v1887_v17 }
 0x273   : > { %1662 = vmatmul.mubr.msk.bf16.gmra.mxu0 %vm652_vm0, %v1797_v22 }
 0x274   : > { %1665 = vmatprep.mubr.msk.bf16.mxu0 %vm2322_vm11, %v1887_v17 }
 0x27b   : > { %1666 = vmatmul.mubr.msk.bf16.gmra.mxu0 %vm652_vm0, %v1798_v23 }
 0x27c   : > { %1669 = vmatprep.mubr.msk.bf16.mxu0 %vm2322_vm11, %v1887_v17 }
 0x283   : > { %1670 = vmatmul.mubr.msk.bf16.gmra.mxu0 %vm652_vm0, %v1799_v24 }
 0x284   : > { %1673 = vmatprep.mubr.msk.bf16.mxu0 %vm2322_vm11, %v1887_v17 }
 0x28b   : > { %1674 = vmatmul.mubr.msk.bf16.gmra.mxu0 %vm652_vm0, %v1800_v25 }
 0x28c   : > { %1677 = vmatprep.mubr.msk.bf16.mxu0 %vm2322_vm11, %v1887_v17 }
 0x293   : > { %1678 = vmatmul.mubr.msk.bf16.gmra.mxu0 %vm652_vm0, %v1801_v26 }
 0x294   : > { %1683 = vmatprep.mubr.msk.bf16.mxu0 %vm2322_vm11, %v1887_v17 }
 0x313   : > { %v714_v27 = vpop.f32.mrf.mxu0 }
 0x314   : > { %v1581_v28 = vpack.c.bf16 %v714_v27, %v714_v27 }
 0x315   : > { %v1647_v29 = vpop.f32.mrf.mxu0 }
 0x316   : > { %794 = vst.msk [vmem:[#allocation4] sm:$0xf] %vm793_vm6, %v1581_v28 }
 0x317   : > { %v717_v30 = vpop.f32.mrf.mxu0 }
 0x318   : > { %v1582_v31 = vpack.c.bf16 %v717_v30, %v717_v30 }
 0x319   : > { %v1648_v32 = vpop.f32.mrf.mxu0 }
 0x31a   : > { %795 = vst.msk [vmem:[#allocation4 + $0x4] sm:$0xf] %vm793_vm6, %v1582_v31 }
 0x31b   : > { %v722_v33 = vpop.f32.mrf.mxu0 }
 0x31c   : > { %v1583_v34 = vpack.c.bf16 %v722_v33, %v722_v33 }
 0x31d   : > { %v1651_v35 = vpop.f32.mrf.mxu0 }
 0x31e   : > { %802 = vrot.lane.b32.xlu0 %v1583_v34, %s1886_s27  ;;  %v916_v35 = vld [vmem:[%s2290_s2] sm:$0x1] }
 0x31f   : > { %v725_v36 = vpop.f32.mrf.mxu0 }
 0x320   : > { %v1584_v37 = vpack.c.bf16 %v725_v36, %v725_v36 }
 0x321   : > { %v1652_v39 = vpop.f32.mrf.mxu0 }
 0x322   : > { %804 = vrot.lane.b32.xlu1 %v1584_v37, %s1886_s27  ;;  %v1117_v39 = vld [vmem:[%s2292_s4] sm:$0x1]  ;;  %s1898_s27 = smov 122  }
 0x323   : > { %v730_v40 = vpop.f32.mrf.mxu0 }
 0x324   : > { %v1585_v41 = vpack.c.bf16 %v730_v40, %v730_v40 }
 0x325   : > { %v1655_v42 = vpop.f32.mrf.mxu0 }
 0x326   : > { %817 = vrot.lane.b32.xlu0 %v1585_v41, %s1890_s16  ;;  %v1803_v42 = vld [vmem:[%s2291_s3] sm:$0xff]  }
 0x327   : > { %v733_v43 = vpop.f32.mrf.mxu0 }
 0x328   : > { %v1586_v44 = vpack.c.bf16 %v733_v43, %v733_v43 }
 0x329   : > { %v1656_v38 = vpop.f32.mrf.mxu0 }
 0x32a   : > { %819 = vrot.lane.b32.xlu1 %v1586_v44, %s1890_s16  ;;  %v1191_v44 = vsel %vm980_vm14, %v1117_v39, 0  ;;  %s1903_s16 = smov 112  }
 0x32b   : > { %v738_v45 = vpop.f32.mrf.mxu0 }
 0x32c   : > { %v1587_v46 = vpack.c.bf16 %v738_v45, %v738_v45 }
 0x32d   : > { %v1659_v47 = vpop.f32.mrf.mxu0 }
 0x32e   : > { %832 = vrot.lane.b32.xlu0 %v1587_v46, %s1891_s17 }
 0x32f   : > { %v741_v48 = vpop.f32.mrf.mxu0 }
 0x330   : > { %v1588_v49 = vpack.c.bf16 %v741_v48, %v741_v48 }
 0x331   : > { %v1660_v50 = vpop.f32.mrf.mxu0 }
 0x332   : > { %834 = vrot.lane.b32.xlu1 %v1588_v49, %s1891_s17  ;;  %s240_s17 = smul.u32 18, %s1455_s22 }
 0x333   : > { %v746_v52 = vpop.f32.mrf.mxu0 }
 0x334   : > { %v1589_v53 = vpack.c.bf16 %v746_v52, %v746_v52  ;;  %p241_p8 = scmp.lt.s32.totalorder %s240_s17, 35 }
 0x335   : > { %v1663_v54 = vpop.f32.mrf.mxu0 }
 0x336   : > { %847 = vrot.lane.b32.xlu0 %v1589_v53, %s1892_s18  ;;  %s2345_s17 = smov (!%p241_p8, %s240_s17), 35 }
 0x337   : > { %v749_v51 = vpop.f32.mrf.mxu0 }
 0x338   : > { %v1590_v55 = vpack.c.bf16 %v749_v51, %v749_v51 }
 0x339   : > { %v1664_v56 = vpop.f32.mrf.mxu0 }
 0x33a   : > { %849 = vrot.lane.b32.xlu1 %v1590_v55, %s1892_s18  ;;  %s1464_s18 = sshll.u32 %s2345_s17, 2 }
 0x33b   : > { %v754_v57 = vpop.f32.mrf.mxu0 }
 0x33c   : > { %v1591_v58 = vpack.c.bf16 %v754_v57, %v754_v57 }
 0x33d   : > { %v1667_v59 = vpop.f32.mrf.mxu0 }
 0x33e   : > { %862 = vrot.lane.b32.xlu0 %v1591_v58, %s1893_s24 }
 0x33f   : > { %v757_v60 = vpop.f32.mrf.mxu0 }
 0x340   : > { %v1592_v61 = vpack.c.bf16 %v757_v60, %v757_v60 }
 0x341   : > { %v1668_v62 = vpop.f32.mrf.mxu0 }
 0x342   : > { %864 = vrot.lane.b32.xlu1 %v1592_v61, %s1893_s24 }
 0x343   : > { %v762_v63 = vpop.f32.mrf.mxu0 }
 0x344   : > { %v1593_v0 = vpack.c.bf16 %v762_v63, %v762_v63 }
 0x345   : > { %v1671_v1 = vpop.f32.mrf.mxu0 }
 0x346   : > { %877 = vrot.lane.b32.xlu0 %v1593_v0, %s1894_s25 }
 0x347   : > { %v765_v2 = vpop.f32.mrf.mxu0 }
 0x348   : > { %v1594_v3 = vpack.c.bf16 %v765_v2, %v765_v2 }
 0x349   : > { %v1672_v4 = vpop.f32.mrf.mxu0 }
 0x34a   : > { %879 = vrot.lane.b32.xlu1 %v1594_v3, %s1894_s25 }
 0x34b   : > { %v770_v5 = vpop.f32.mrf.mxu0 }
 0x34c   : > { %v1595_v6 = vpack.c.bf16 %v770_v5, %v770_v5 }
 0x34d   : > { %v1675_v7 = vpop.f32.mrf.mxu0 }
 0x34e   : > { %892 = vrot.lane.b32.xlu0 %v1595_v6, %s1895_s28 }
 0x34f   : > { %v773_v8 = vpop.f32.mrf.mxu0 }
 0x350   : > { %v1596_v9 = vpack.c.bf16 %v773_v8, %v773_v8 }
 0x351   : > { %v1676_v10 = vpop.f32.mrf.mxu0 }
 0x352   : > { %894 = vrot.lane.b32.xlu1 %v1596_v9, %s1895_s28  ;;  %s2237_s28 = scalar_lea.vmem %s2293_s5, %s1464_s18 }
 0x353   : > { %v778_v11 = vpop.f32.mrf.mxu0 }
 0x354   : > { %v1597_v12 = vpack.c.bf16 %v778_v11, %v778_v11 }
 0x355   : > { %v1679_v13 = vpop.f32.mrf.mxu0 }
 0x356   : > { %907 = vrot.lane.b32.xlu0 %v1597_v12, %s1896_s29 }
 0x357   : > { %v781_v14 = vpop.f32.mrf.mxu0 }
 0x358   : > { %v1598_v15 = vpack.c.bf16 %v781_v14, %v781_v14 }
 0x359   : > { %v1680_v16 = vpop.f32.mrf.mxu0 }
 0x35a   : > { %909 = vrot.lane.b32.xlu1 %v1598_v15, %s1896_s29 }
 0x390   : > { %v803_v18 = vpop.permute.xlu0 %802 }
 0x391   : > { %809 = vst.msk [vmem:[#allocation4] sm:$0xf] %vm808_vm2, %v803_v18 }
 0x394   : > { %v805_v19 = vpop.permute.xlu1 %804 }
 0x395   : > { %810 = vst.msk [vmem:[#allocation4 + $0x4] sm:$0xf] %vm808_vm2, %v805_v19 }
 0x398   : > { %v818_v20 = vpop.permute.xlu0 %817 }
 0x399   : > { %824 = vst.msk [vmem:[#allocation4] sm:$0xf] %vm823_vm12, %v818_v20 }
 0x39c   : > { %v820_v21 = vpop.permute.xlu1 %819 }
 0x39d   : > { %825 = vst.msk [vmem:[#allocation4 + $0x4] sm:$0xf] %vm823_vm12, %v820_v21 }
 0x3a0   : > { %v833_v22 = vpop.permute.xlu0 %832 }
 0x3a1   : > { %839 = vst.msk [vmem:[#allocation4] sm:$0xf] %vm838_vm15, %v833_v22 }
 0x3a4   : > { %v835_v23 = vpop.permute.xlu1 %834 }
 0x3a5   : > { %840 = vst.msk [vmem:[#allocation4 + $0x4] sm:$0xf] %vm838_vm15, %v835_v23 }
 0x3a8   : > { %v848_v24 = vpop.permute.xlu0 %847 }
 0x3a9   : > { %854 = vst.msk [vmem:[#allocation4] sm:$0xf] %vm853_vm8, %v848_v24 }
 0x3ac   : > { %v850_v25 = vpop.permute.xlu1 %849 }
 0x3ad   : > { %855 = vst.msk [vmem:[#allocation4 + $0x4] sm:$0xf] %vm853_vm8, %v850_v25 }
 0x3b0   : > { %v863_v26 = vpop.permute.xlu0 %862 }
 0x3b1   : > { %869 = vst.msk [vmem:[#allocation4] sm:$0xf] %vm868_vm3, %v863_v26 }
 0x3b4   : > { %v865_v27 = vpop.permute.xlu1 %864 }
 0x3b5   : > { %870 = vst.msk [vmem:[#allocation4 + $0x4] sm:$0xf] %vm868_vm3, %v865_v27 }
 0x3b8   : > { %v878_v28 = vpop.permute.xlu0 %877 }
 0x3b9   : > { %884 = vst.msk [vmem:[#allocation4] sm:$0xf] %vm883_vm13, %v878_v28 }
 0x3bc   : > { %v880_v29 = vpop.permute.xlu1 %879 }
 0x3bd   : > { %885 = vst.msk [vmem:[#allocation4 + $0x4] sm:$0xf] %vm883_vm13, %v880_v29 }
 0x3c0   : > { %v893_v30 = vpop.permute.xlu0 %892 }
 0x3c1   : > { %899 = vst.msk [vmem:[#allocation4] sm:$0xf] %vm898_vm9, %v893_v30 }
 0x3c4   : > { %v895_v31 = vpop.permute.xlu1 %894 }
 0x3c5   : > { %900 = vst.msk [vmem:[#allocation4 + $0x4] sm:$0xf] %vm898_vm9, %v895_v31 }
 0x3c8   : > { %v908_v32 = vpop.permute.xlu0 %907 }
 0x3c9   : > { %914 = vst.msk [vmem:[#allocation4] sm:$0xf] %vm913_vm5, %v908_v32 }
 0x3cc   : > { %v910_v33 = vpop.permute.xlu1 %909 }
 0x3cd   : > { %915 = vst.msk [vmem:[#allocation4 + $0x4] sm:$0xf] %vm913_vm5, %v910_v33 }
 0x3d4   : > { %v1802_v34 = vld [vmem:[#allocation4] sm:$0xff]  }
 0x3d5   : > { %1682 = vmatpush3.bf16.msra.mxu0 %v1802_v34 }
 0x3d8   : > { %1684 = vmatmul.mubr.msk.bf16.vlgmr.msra.gmra.mxu0 %vm652_vm0, %v916_v35  ;;  %vm2323_vm0 = vmmov %vm2308_vm1 }
 0x3d9   : > { %vm2324_vm4 = vmmov %vm2323_vm0 }
 0x3da   : > { %vm2325_vm1 = vmmov %vm2323_vm0 }
 0x3db   : > { %vm2326_vm10 = vmmov %vm2323_vm0 }
 0x3dc   : > { %vm2329_vm2 = vmmov %vm2323_vm0 }
 0x3dd   : > { %vm2330_vm12 = vmmov %vm2323_vm0 }
 0x3de   : > { %vm2331_vm15 = vmmov %vm2323_vm0 }
 0x3df   : > { %vm2332_vm8 = vmmov %vm2323_vm0 }
 0x3e0   : > { %vm2333_vm3 = vmmov %vm2323_vm0 }
 0x3e1   : > { %vm2334_vm13 = vmmov %vm2323_vm0 }
 0x3e2   : > { %vm2335_vm9 = vmmov %vm2323_vm0 }
 0x3e3   : > { %vm2336_vm5 = vmmov %vm2323_vm0 }
 0x498   : > { %v962_v36 = vpop.f32.mrf.mxu0 }
 0x499   : > { %v970_v37 = vpack.c.bf16 %v962_v36, %v962_v36 }
 0x49a   : > { %v1685_v40 = vpop.f32.mrf.mxu0 }
 0x49b   : > { %v982_v41 = vsel %vm980_vm14, %v970_v37, 0  ;;  %vm2337_vm14 = vmmov %vm2323_vm0 }
 0x49c   : > { %1688 = vmatpush3.bf16.msra.mxu1 %v982_v41  ;;  %v965_v43 = vpop.f32.mrf.mxu0 }
 0x49d   : > { %1693 = vmatprep.subr.bf16.mxu1 %v1887_v17 }
 0x49e   : > { %v1686_v38 = vpop.f32.mrf.mxu0 }
 0x49f   : > { %1690 = vmatmul.mubr.msk.bf16.vlgmr.msra.gmra.mxu1 %vm976_vm7, %v1803_v42 }
 0x4a0   : > { %1694 = vmatpush3.bf16.msra.mxu1 %v1191_v44  ;;  %1695 = vmatprep.mubr.msk.bf16.mxu1 %vm2322_vm11, %v1887_v17 }
 0x55f   : > { %v1018_v45 = vpop.f32.mrf.mxu1 }
 0x560   : > { %v1599_v46 = vpack.c.bf16 %v1018_v45, %v1018_v45 }
 0x561   : > { %v1691_v47 = vpop.f32.mrf.mxu1 }
 0x562   : > { %1033 = vst.msk [vmem:[#allocation5] sm:$0xf] %vm793_vm6, %v1599_v46  ;;  %1035 = vrot.lane.b32.xlu0 %v1599_v46, %s1885_s8 }
 0x563   : > { %v1021_v48 = vpop.f32.mrf.mxu1 }
 0x564   : > { %v1600_v49 = vpack.c.bf16 %v1021_v48, %v1021_v48 }
 0x565   : > { %v1692_v50 = vpop.f32.mrf.mxu1 }
 0x566   : > { %1034 = vst.msk [vmem:[#allocation5 + $0x4] sm:$0xf] %vm793_vm6, %v1600_v49  ;;  %1037 = vrot.lane.b32.xlu1 %v1600_v49, %s1885_s8  ;;  %1043 = vrot.lane.b32.xlu0 %v1599_v46, %s1897_s15  ;;  %s1902_s8 = smov 114  }
 0x56a   : > { %1045 = vrot.lane.b32.xlu1 %v1600_v49, %s1897_s15  ;;  %1051 = vrot.lane.b32.xlu0 %v1599_v46, %s1898_s27 }
 0x56d   : > { %v1804_v52 = vld [vmem:[#allocation5] sm:$0xff]  }
 0x56e   : > { %1053 = vrot.lane.b32.xlu1 %v1600_v49, %s1898_s27  ;;  %1059 = vrot.lane.b32.xlu0 %v1599_v46, %s1899_s10 }
 0x56f   : > { %1696 = vmatmul.mubr.msk.bf16.vlgmr.msra.gmra.mxu1 %vm976_vm7, %v1804_v52 }
 0x570   : > { %1699 = vmatprep.mubr.msk.bf16.mxu1 %vm2322_vm11, %v1887_v17 }
 0x572   : > { %1061 = vrot.lane.b32.xlu1 %v1600_v49, %s1899_s10  ;;  %1067 = vrot.lane.b32.xlu0 %v1599_v46, %s1900_s11 }
 0x576   : > { %1069 = vrot.lane.b32.xlu1 %v1600_v49, %s1900_s11  ;;  %1075 = vrot.lane.b32.xlu0 %v1599_v46, %s1901_s12 }
 0x57a   : > { %1077 = vrot.lane.b32.xlu1 %v1600_v49, %s1901_s12  ;;  %1083 = vrot.lane.b32.xlu0 %v1599_v46, %s1902_s8 }
 0x57e   : > { %1085 = vrot.lane.b32.xlu1 %v1600_v49, %s1902_s8  ;;  %1091 = vrot.lane.b32.xlu0 %v1599_v46, %s1903_s16 }
 0x582   : > { %1093 = vrot.lane.b32.xlu1 %v1600_v49, %s1903_s16 }
 0x5d4   : > { %v1036_v53 = vpop.permute.xlu0 %1035 }
 0x5d5   : > { %1041 = vst.msk [vmem:[#allocation5 + $0x8] sm:$0xf] %vm793_vm6, %v1036_v53 }
 0x5d8   : > { %v1038_v54 = vpop.permute.xlu1 %1037  ;;  %v1044_v51 = vpop.permute.xlu0 %1043 }
 0x5d9   : > { %1042 = vst.msk [vmem:[#allocation5 + $0xc] sm:$0xf] %vm793_vm6, %v1038_v54  ;;  %1049 = vst.msk [vmem:[#allocation5 + $0x10] sm:$0xf] %vm793_vm6, %v1044_v51 }
 0x5dc   : > { %v1046_v55 = vpop.permute.xlu1 %1045  ;;  %v1052_v56 = vpop.permute.xlu0 %1051 }
 0x5dd   : > { %1050 = vst.msk [vmem:[#allocation5 + $0x14] sm:$0xf] %vm793_vm6, %v1046_v55  ;;  %1057 = vst.msk [vmem:[#allocation5 + $0x18] sm:$0xf] %vm793_vm6, %v1052_v56 }
 0x5e0   : > { %v1805_v57 = vld [vmem:[#allocation5 + $0x8] sm:$0xff]   ;;  %v1054_v58 = vpop.permute.xlu1 %1053  ;;  %v1060_v59 = vpop.permute.xlu0 %1059 }
 0x5e1   : > { %1058 = vst.msk [vmem:[#allocation5 + $0x1c] sm:$0xf] %vm793_vm6, %v1054_v58  ;;  %1065 = vst.msk [vmem:[#allocation5 + $0x20] sm:$0xf] %vm793_vm6, %v1060_v59  ;;  %1700 = vmatmul.mubr.msk.bf16.gmra.mxu1 %vm976_vm7, %v1805_v57 }
 0x5e2   : > { %1703 = vmatprep.mubr.msk.bf16.mxu1 %vm2322_vm11, %v1887_v17 }
 0x5e4   : > { %v1062_v60 = vpop.permute.xlu1 %1061  ;;  %v1068_v61 = vpop.permute.xlu0 %1067  ;;  %v1806_v62 = vld [vmem:[#allocation5 + $0x10] sm:$0xff]  }
 0x5e5   : > { %1066 = vst.msk [vmem:[#allocation5 + $0x24] sm:$0xf] %vm793_vm6, %v1062_v60  ;;  %1073 = vst.msk [vmem:[#allocation5 + $0x28] sm:$0xf] %vm793_vm6, %v1068_v61 }
 0x5e8   : > { %v1070_v63 = vpop.permute.xlu1 %1069  ;;  %v1076_v0 = vpop.permute.xlu0 %1075  ;;  %v1807_v3 = vld [vmem:[#allocation5 + $0x18] sm:$0xff]  }
 0x5e9   : > { %1074 = vst.msk [vmem:[#allocation5 + $0x2c] sm:$0xf] %vm793_vm6, %v1070_v63  ;;  %1081 = vst.msk [vmem:[#allocation5 + $0x30] sm:$0xf] %vm793_vm6, %v1076_v0  ;;  %1704 = vmatmul.mubr.msk.bf16.gmra.mxu1 %vm976_vm7, %v1806_v62 }
 0x5ea   : > { %1707 = vmatprep.mubr.msk.bf16.mxu1 %vm2322_vm11, %v1887_v17 }
 0x5ec   : > { %v1078_v1 = vpop.permute.xlu1 %1077  ;;  %v1084_v2 = vpop.permute.xlu0 %1083  ;;  %v1808_v7 = vld [vmem:[#allocation5 + $0x20] sm:$0xff]  }
 0x5ed   : > { %1082 = vst.msk [vmem:[#allocation5 + $0x34] sm:$0xf] %vm793_vm6, %v1078_v1  ;;  %1089 = vst.msk [vmem:[#allocation5 + $0x38] sm:$0xf] %vm793_vm6, %v1084_v2 }
 0x5f0   : > { %v1086_v4 = vpop.permute.xlu1 %1085  ;;  %v1092_v5 = vpop.permute.xlu0 %1091  ;;  %v1809_v8 = vld [vmem:[#allocation5 + $0x28] sm:$0xff]  }
 0x5f1   : > { %1090 = vst.msk [vmem:[#allocation5 + $0x3c] sm:$0xf] %vm793_vm6, %v1086_v4  ;;  %1097 = vst.msk [vmem:[#allocation5 + $0x40] sm:$0xf] %vm793_vm6, %v1092_v5  ;;  %1708 = vmatmul.mubr.msk.bf16.gmra.mxu1 %vm976_vm7, %v1807_v3 }
 0x5f2   : > { %1711 = vmatprep.mubr.msk.bf16.mxu1 %vm2322_vm11, %v1887_v17 }
 0x5f4   : > { %v1094_v6 = vpop.permute.xlu1 %1093  ;;  %v1810_v9 = vld [vmem:[#allocation5 + $0x30] sm:$0xff]  }
 0x5f5   : > { %1098 = vst.msk [vmem:[#allocation5 + $0x44] sm:$0xf] %vm793_vm6, %v1094_v6  ;;  %vm2328_vm6 = vmmov %vm2323_vm0 }
 0x5f8   : > { %v1811_v10 = vld [vmem:[#allocation5 + $0x38] sm:$0xff]  }
 0x5f9   : > { %1712 = vmatmul.mubr.msk.bf16.gmra.mxu1 %vm976_vm7, %v1808_v7 }
 0x5fa   : > { %1715 = vmatprep.mubr.msk.bf16.mxu1 %vm2322_vm11, %v1887_v17 }
 0x5fc   : > { %v1812_v11 = vld [vmem:[#allocation5 + $0x40] sm:$0xff]  }
 0x601   : > { %1716 = vmatmul.mubr.msk.bf16.gmra.mxu1 %vm976_vm7, %v1809_v8 }
 0x602   : > { %1719 = vmatprep.mubr.msk.bf16.mxu1 %vm2322_vm11, %v1887_v17 }
 0x609   : > { %1720 = vmatmul.mubr.msk.bf16.gmra.mxu1 %vm976_vm7, %v1810_v9 }
 0x60a   : > { %1723 = vmatprep.mubr.msk.bf16.mxu1 %vm2322_vm11, %v1887_v17 }
 0x611   : > { %1724 = vmatmul.mubr.msk.bf16.gmra.mxu1 %vm976_vm7, %v1811_v10 }
 0x612   : > { %1727 = vmatprep.mubr.msk.bf16.mxu1 %vm2322_vm11, %v1887_v17  ;;  %vm2327_vm11 = vmmov %vm2323_vm0 }
 0x619   : > { %1728 = vmatmul.mubr.msk.bf16.gmra.mxu1 %vm976_vm7, %v1812_v11  ;;  %vm2338_vm7 = vmmov %vm2323_vm0 }
 0x62f   : > { %v1227_v12 = vpop.f32.mrf.mxu1 }
 0x630   : > { %v1601_v13 = vpack.c.bf16 %v1227_v12, %v1227_v12 }
 0x631   : > { %v1697_v17 = vpop.f32.mrf.mxu1 }
 0x632   : > { %1370 = vst.msk [vmem:[%s2237_s28] sm:$0xf] %vm2323_vm0, %v1601_v13 }
 0x633   : > { %v1230_v14 = vpop.f32.mrf.mxu1 }
 0x634   : > { %v1602_v15 = vpack.c.bf16 %v1230_v14, %v1230_v14 }
 0x635   : > { %v1698_v16 = vpop.f32.mrf.mxu1 }
 0x636   : > { %1371 = vst.msk [vmem:[%s2237_s28 + $0x4] sm:$0xf] %vm2324_vm4, %v1602_v15  ;;  %vm2339_vm4 = vmmov %vm2323_vm0 }
 0x6a1   : > { %v1235_v18 = vpop.f32.mrf.mxu1 }
 0x6a2   : > { %v1603_v19 = vpack.c.bf16 %v1235_v18, %v1235_v18 }
 0x6a3   : > { %v1701_v20 = vpop.f32.mrf.mxu1 }
 0x6a4   : > { %1372 = vst.msk [vmem:[%s2237_s28 + $0x8] sm:$0xf] %vm2325_vm1, %v1603_v19 }
 0x6a5   : > { %v1238_v21 = vpop.f32.mrf.mxu1 }
 0x6a6   : > { %v1604_v22 = vpack.c.bf16 %v1238_v21, %v1238_v21 }
 0x6a7   : > { %v1702_v23 = vpop.f32.mrf.mxu1 }
 0x6a8   : > { %1373 = vst.msk [vmem:[%s2237_s28 + $0xc] sm:$0xf] %vm2326_vm10, %v1604_v22 }
 0x6a9   : > { %v1243_v24 = vpop.f32.mrf.mxu1 }
 0x6aa   : > { %v1605_v25 = vpack.c.bf16 %v1243_v24, %v1243_v24 }
 0x6ab   : > { %v1705_v26 = vpop.f32.mrf.mxu1 }
 0x6ac   : > { %1374 = vst.msk [vmem:[%s2237_s28 + $0x10] sm:$0xf] %vm2327_vm11, %v1605_v25 }
 0x6ad   : > { %v1246_v27 = vpop.f32.mrf.mxu1 }
 0x6ae   : > { %v1606_v28 = vpack.c.bf16 %v1246_v27, %v1246_v27 }
 0x6af   : > { %v1706_v29 = vpop.f32.mrf.mxu1 }
 0x6b0   : > { %1375 = vst.msk [vmem:[%s2237_s28 + $0x14] sm:$0xf] %vm2328_vm6, %v1606_v28 }
 0x6b1   : > { %v1251_v30 = vpop.f32.mrf.mxu1 }
 0x6b2   : > { %v1607_v31 = vpack.c.bf16 %v1251_v30, %v1251_v30 }
 0x6b3   : > { %v1709_v32 = vpop.f32.mrf.mxu1 }
 0x6b4   : > { %1376 = vst.msk [vmem:[%s2237_s28 + $0x18] sm:$0xf] %vm2329_vm2, %v1607_v31 }
 0x6b5   : > { %v1254_v33 = vpop.f32.mrf.mxu1 }
 0x6b6   : > { %v1608_v34 = vpack.c.bf16 %v1254_v33, %v1254_v33 }
 0x6b7   : > { %v1710_v35 = vpop.f32.mrf.mxu1 }
 0x6b8   : > { %1377 = vst.msk [vmem:[%s2237_s28 + $0x1c] sm:$0xf] %vm2330_vm12, %v1608_v34 }
 0x6b9   : > { %v1259_v36 = vpop.f32.mrf.mxu1 }
 0x6ba   : > { %v1609_v37 = vpack.c.bf16 %v1259_v36, %v1259_v36 }
 0x6bb   : > { %v1713_v39 = vpop.f32.mrf.mxu1 }
 0x6bc   : > { %1378 = vst.msk [vmem:[%s2237_s28 + $0x20] sm:$0xf] %vm2331_vm15, %v1609_v37 }
 0x6bd   : > { %v1262_v40 = vpop.f32.mrf.mxu1 }
 0x6be   : > { %v1610_v41 = vpack.c.bf16 %v1262_v40, %v1262_v40 }
 0x6bf   : > { %v1714_v42 = vpop.f32.mrf.mxu1 }
 0x6c0   : > { %1379 = vst.msk [vmem:[%s2237_s28 + $0x24] sm:$0xf] %vm2332_vm8, %v1610_v41 }
 0x6c1   : > { %v1267_v43 = vpop.f32.mrf.mxu1 }
 0x6c2   : > { %v1611_v44 = vpack.c.bf16 %v1267_v43, %v1267_v43 }
 0x6c3   : > { %v1717_v38 = vpop.f32.mrf.mxu1 }
 0x6c4   : > { %1380 = vst.msk [vmem:[%s2237_s28 + $0x28] sm:$0xf] %vm2333_vm3, %v1611_v44 }
 0x6c5   : > { %v1270_v45 = vpop.f32.mrf.mxu1 }
 0x6c6   : > { %v1612_v46 = vpack.c.bf16 %v1270_v45, %v1270_v45 }
 0x6c7   : > { %v1718_v47 = vpop.f32.mrf.mxu1 }
 0x6c8   : > { %1381 = vst.msk [vmem:[%s2237_s28 + $0x2c] sm:$0xf] %vm2334_vm13, %v1612_v46 }
 0x6c9   : > { %v1275_v48 = vpop.f32.mrf.mxu1 }
 0x6ca   : > { %v1613_v49 = vpack.c.bf16 %v1275_v48, %v1275_v48 }
 0x6cb   : > { %v1721_v50 = vpop.f32.mrf.mxu1 }
 0x6cc   : > { %1382 = vst.msk [vmem:[%s2237_s28 + $0x30] sm:$0xf] %vm2335_vm9, %v1613_v49 }
 0x6cd   : > { %v1278_v52 = vpop.f32.mrf.mxu1 }
 0x6ce   : > { %v1614_v53 = vpack.c.bf16 %v1278_v52, %v1278_v52 }
 0x6cf   : > { %v1722_v54 = vpop.f32.mrf.mxu1 }
 0x6d0   : > { %1383 = vst.msk [vmem:[%s2237_s28 + $0x34] sm:$0xf] %vm2336_vm5, %v1614_v53 }
 0x6d1   : > { %v1283_v51 = vpop.f32.mrf.mxu1 }
 0x6d2   : > { %v1615_v55 = vpack.c.bf16 %v1283_v51, %v1283_v51 }
 0x6d3   : > { %v1725_v56 = vpop.f32.mrf.mxu1 }
 0x6d4   : > { %1384 = vst.msk [vmem:[%s2237_s28 + $0x38] sm:$0xf] %vm2337_vm14, %v1615_v55 }
 0x6d5   : > { %v1286_v57 = vpop.f32.mrf.mxu1 }
 0x6d6   : > { %v1616_v58 = vpack.c.bf16 %v1286_v57, %v1286_v57 }
 0x6d7   : > { %v1726_v59 = vpop.f32.mrf.mxu1 }
 0x6d8   : > { %1385 = vst.msk [vmem:[%s2237_s28 + $0x3c] sm:$0xf] %vm2338_vm7, %v1616_v58 }
 0x6d9   : > { %v1291_v60 = vpop.f32.mrf.mxu1 }
 0x6da   : > { %v1617_v61 = vpack.c.bf16 %v1291_v60, %v1291_v60 }
 0x6db   : > { %v1729_v62 = vpop.f32.mrf.mxu1 }
 0x6dc   : > { %1386 = vst.msk [vmem:[%s2237_s28 + $0x40] sm:$0xf] %vm2323_vm0, %v1617_v61 }
 0x6dd   : > { %v1294_v63 = vpop.f32.mrf.mxu1 }
 0x6de   : > { %v1618_v0 = vpack.c.bf16 %v1294_v63, %v1294_v63 }
 0x6df   : > { %v1730_v1 = vpop.f32.mrf.mxu1 }
 0x6e0   : > { %1387 = vst.msk [vmem:[%s2237_s28 + $0x44] sm:$0xf] %vm2339_vm4, %v1618_v0 }
 0x6e1 PF: > { %p15_p9 = scmp.ge.s32.totalorder %s1954_s23, 4   ;;  %s2340_s18 = smov %s1871_s19 }
 0x6e2   : > { %s2341_s19 = smov %s1875_s20  ;;  %s2342_s20 = smov %s1964_s26 }
 0x6e3   : > { %s2343_s21 = smov %s1954_s23  ;;  %17 = sbr.rel (!%p15_p9) target bundleno = 3 (0x3), region = 80 }
 0x6e8   :  { %1410 = vsyncpa [#allocation7], 1 }
 0x6e9   :  { %1412 = vsyncpa [#allocation7 + $0x1], 1 }

</bundles_post_ra>
